<compile_context>
chip_gen: v6e
topology: v6e:2x2x1
jax: 0.10.0
libtpu: 0.0.40
codegen_flags: <defaults>
</compile_context>

<pallas_src>
import jax
import jax.numpy as jnp
from jax.experimental import pallas as pl
from jax.experimental.pallas import tpu as pltpu

LANE = 128
_NAMES = ["gcn1", "gcn2", "gcn3", "lin1", "lin2", "lin3"]


def _round_up(x, m):
    return ((x + m - 1) // m) * m


def _pad2d(x, rows, cols):
    return jnp.pad(x, ((0, rows - x.shape[0]), (0, cols - x.shape[1])))


# ---------------------------------------------------------------------------
# Fused kernel: 3x (proj = H@W ; H = ReLU(A_tile@proj + b), A streamed from
# HBM with a double-buffered manual DMA) followed by 3x (H = ReLU(H@W + b)).
# Activations stay resident in VMEM for the whole forward pass.
# ---------------------------------------------------------------------------
def _fused_forward_kernel(a_hbm, x_ref, w_ref, b_ref, o_ref,
                          abuf, act, proj, sem):
    n_pad, f_pad = act.shape
    tm = abuf.shape[1]
    n_tiles = n_pad // tm

    def a_copy(row_start, slot):
        return pltpu.make_async_copy(
            a_hbm.at[pl.ds(row_start, tm), :], abuf.at[slot], sem.at[slot])

    act[...] = x_ref[...]                                 # bf16 activations

    # ---- 3 GCN layers: H <- ReLU(A @ (H @ W_l) + b_l) ----------------------
    for l in range(3):
        # Full projection first (needs all rows); bf16 MXU inputs, f32 accum.
        proj[...] = jnp.dot(act[...], w_ref[l],
                            preferred_element_type=jnp.float32
                            ).astype(jnp.bfloat16)
        bias = b_ref[l]                                   # (1, f_pad) f32
        a_copy(0, 0).start()                              # prime tile 0

        @pl.loop(0, n_tiles)
        def _(t):
            slot = t & 1
            a_copy(0, slot).wait()                        # current tile ready

            @pl.when(t + 1 < n_tiles)
            def _():                                      # prefetch next tile
                nxt = pl.multiple_of((t + 1) * tm, tm)
                a_copy(nxt, 1 - slot).start()

            agg = jnp.dot(abuf[slot], proj[...],
                          preferred_element_type=jnp.float32)        # MXU
            h = jnp.maximum(agg + bias, 0.0)                          # f32 VPU
            row = pl.multiple_of(t * tm, tm)
            act[pl.ds(row, tm), :] = h.astype(jnp.bfloat16)

    # ---- 3 dense layers: H <- ReLU(H @ W_l + b_l), row-wise -----------------
    h = act[...]
    out_f32 = None
    for l in range(3, 6):
        out_f32 = jnp.maximum(
            jnp.dot(h, w_ref[l], preferred_element_type=jnp.float32)
            + b_ref[l], 0.0)
        h = out_f32.astype(jnp.bfloat16)
    o_ref[...] = out_f32                                  # lane-dense f32 store


_VMEM = pl.BlockSpec(memory_space=pltpu.MemorySpace.VMEM)
_ANY = pl.BlockSpec(memory_space=pl.ANY)


def _pick_tm(n_pad):
    for tm in (512, 256, 128):
        if tm <= n_pad and n_pad % tm == 0:
            return tm
    return n_pad  # unreachable: n_pad is always a multiple of 128


def _vmem_limit_bytes(n_pad, f_pad, tm):
    need = (n_pad * f_pad * 2            # x (bf16)
            + 6 * f_pad * f_pad * 2      # weight slab (bf16)
            + 6 * f_pad * 4              # bias slab (f32)
            + n_pad * f_pad * 4          # output (f32)
            + 2 * tm * n_pad * 2         # A row-tile double buffer (bf16)
            + 2 * n_pad * f_pad * 2)     # act + proj scratch (bf16)
    return int(min(max(2 * need + (4 << 20), 16 << 20), 64 << 20))


def _fused_forward(a_pad, x_pad, w_slab, b_slab):
    n_pad, f_pad = x_pad.shape
    tm = _pick_tm(n_pad)
    return pl.pallas_call(
        _fused_forward_kernel,
        out_shape=jax.ShapeDtypeStruct((n_pad, f_pad), jnp.float32),
        in_specs=[_ANY, _VMEM, _VMEM, _VMEM],
        out_specs=_VMEM,
        scratch_shapes=[
            pltpu.VMEM((2, tm, n_pad), jnp.bfloat16),   # A row-tile double buffer
            pltpu.VMEM((n_pad, f_pad), jnp.bfloat16),   # resident activations
            pltpu.VMEM((n_pad, f_pad), jnp.bfloat16),   # per-layer projection
            pltpu.SemaphoreType.DMA((2,)),
        ],
        compiler_params=pltpu.CompilerParams(
            vmem_limit_bytes=_vmem_limit_bytes(n_pad, f_pad, tm)),
    )(a_pad, x_pad, w_slab, b_slab)
    # TODO(synk): for a multi-core (v7x) / very large-N variant, replace the
    # in-kernel tile loop with a row grid marked "parallel" and, for truly
    # sparse graphs, an edge-list SpMM via PrefetchScalarGridSpec.


# ---------------------------------------------------------------------------
# Glue: symmetric-normalized dense adjacency (PyG gcn_norm semantics)
# ---------------------------------------------------------------------------
def normalized_adjacency(edge_index, num_nodes):
    row, col = edge_index[0], edge_index[1]          # source -> target
    a = jnp.zeros((num_nodes, num_nodes), jnp.float32).at[col, row].add(1.0)
    missing = (jnp.diagonal(a) == 0).astype(jnp.float32)
    a = a + jnp.diag(missing)                        # add_remaining_self_loops
    deg = a.sum(axis=1)
    dinv = jnp.where(deg > 0, 1.0 / jnp.sqrt(deg), 0.0)
    return a * dinv[:, None] * dinv[None, :]


# ---------------------------------------------------------------------------
# Params: init (matches torch layer sizes) + one-time packing into two slabs
# ---------------------------------------------------------------------------
def init_params(key, input_size):
    dims = [(input_size, 100), (100, 50), (50, 25),   # GCN1..3
            (25, 25), (25, 10), (10, 1)]              # linear, linear2, linear3
    params = {}
    for name, (fin, fout) in zip(_NAMES, dims):
        key, kw, kb = jax.random.split(key, 3)
        scale = 1.0 / jnp.sqrt(jnp.float32(fin))
        params[f"{name}_w"] = jax.random.uniform(
            kw, (fin, fout), jnp.float32, -scale, scale)
        params[f"{name}_b"] = jax.random.uniform(
            kb, (fout,), jnp.float32, -scale, scale)
    return params


def prepare_params(params):
    """Hoisted once: pad every layer to a common F_pad and stack into slabs."""
    f_pad = LANE
    for name in _NAMES:
        w = params[f"{name}_w"]
        f_pad = max(f_pad, _round_up(w.shape[0], LANE), _round_up(w.shape[1], LANE))
    ws, bs = [], []
    for name in _NAMES:
        w = params[f"{name}_w"].astype(jnp.float32)
        b = params[f"{name}_b"].astype(jnp.float32).reshape(1, -1)
        ws.append(_pad2d(w, f_pad, f_pad))
        bs.append(_pad2d(b, 1, f_pad))
    w_slab = jnp.stack(ws).astype(jnp.bfloat16)   # (6, F_pad, F_pad) bf16
    b_slab = jnp.stack(bs)                        # (6, 1, F_pad) f32
    return w_slab, b_slab


# ---------------------------------------------------------------------------
# Forward (fully jitted: adjacency build + padding + one fused pallas_call)
# ---------------------------------------------------------------------------
@jax.jit
def graphconv_forward(w_slab, b_slab, input_features, edge_index):
    n, _ = input_features.shape
    f_pad = w_slab.shape[-1]
    n_pad = max(_round_up(n, LANE), LANE)        # lane-aligned contraction dim
    a = normalized_adjacency(edge_index, n)
    a_pad = _pad2d(a, n_pad, n_pad).astype(jnp.bfloat16)
    x_pad = _pad2d(input_features.astype(jnp.float32),
                   n_pad, f_pad).astype(jnp.bfloat16)
    out_pad = _fused_forward(a_pad, x_pad, w_slab, b_slab)   # (N_pad, F_pad)
    return out_pad[:n, :1]                                   # real [N, 1] column


# TODO(synk): trainModel (Adam optimizer, MSE loss, training loop) is host-side
# training logic with no Pallas equivalent; only the forward pass is implemented.

if __name__ == "__main__":
    key = jax.random.PRNGKey(0)
    k_params, k_x, k_src, k_dst = jax.random.split(key, 4)

    num_nodes = 16
    input_size = 32
    num_edges = 40

    params = init_params(k_params, input_size)
    w_slab, b_slab = prepare_params(params)   # packed / padded once

    x = jax.random.normal(k_x, (num_nodes, input_size), jnp.float32)
    src = jax.random.randint(k_src, (num_edges,), 0, num_nodes, jnp.int32)
    dst = jax.random.randint(k_dst, (num_edges,), 0, num_nodes, jnp.int32)
    edge_index = jnp.stack([src, dst], axis=0)  # [2, E], like PyG

    out = graphconv_forward(w_slab, b_slab, x, edge_index)
    out = jax.block_until_ready(out)
    assert out.shape == (num_nodes, 1), out.shape
    assert bool(jnp.all(jnp.isfinite(out)))
    print("KERNEL_OK")
</pallas_src>

<mosaic_0001>
module attributes {stable_mosaic.version = 11 : i64} {
  func.func private @main(%arg0: i32) attributes {dimension_semantics = [#tpu.dimension_semantics<core_parallel>], iteration_bounds = array<i64: 2>, tpu.core_type = #tpu.core_type<sc_scalar_subcore>, window_params = []} {
    return
  }
}

module attributes {stable_mosaic.version = 11 : i64} {
  func.func private @main(%arg0: i32) attributes {dimension_semantics = [#tpu.dimension_semantics<core_parallel>], iteration_bounds = array<i64: 2>, tpu.core_type = #tpu.core_type<sc_scalar_subcore>, window_params = []} {
    return
  }
}

module attributes {stable_mosaic.version = 11 : i64} {
  func.func @_fused_forward_kernel(%arg0: memref<128x128xbf16, #tpu.memory_space<any>>, %arg1: memref<128x128xbf16, #tpu.memory_space<vmem>>, %arg2: memref<6x128x128xbf16, #tpu.memory_space<vmem>>, %arg3: memref<6x1x128xf32, #tpu.memory_space<vmem>>, %arg4: memref<128x128xf32, #tpu.memory_space<vmem>>, %arg5: memref<2x128x128xbf16, #tpu.memory_space<vmem>>, %arg6: memref<128x128xbf16, #tpu.memory_space<vmem>>, %arg7: memref<128x128xbf16, #tpu.memory_space<vmem>>, %arg8: memref<2x!tpu.dma_semaphore, #tpu.memory_space<semaphore_mem>>) attributes {dimension_semantics = [], scalar_prefetch = 0 : i64, scratch_operands = 4 : i64, tpu.core_type = #tpu.core_type<tc>} {
    %c0 = arith.constant 0 : index
    %c0_0 = arith.constant 0 : index
    %0 = vector.load %arg1[%c0, %c0_0] : memref<128x128xbf16, #tpu.memory_space<vmem>>, vector<128x128xbf16>
    %c0_1 = arith.constant 0 : index
    %c0_2 = arith.constant 0 : index
    %1 = vector.load %arg6[%c0_1, %c0_2] : memref<128x128xbf16, #tpu.memory_space<vmem>>, vector<128x128xbf16>
    tpu.vector_store %arg6[%c0_1, %c0_2], %0 {strides = array<i32>} : memref<128x128xbf16, #tpu.memory_space<vmem>>, vector<128x128xbf16>,
    %c0_3 = arith.constant 0 : index
    %c0_4 = arith.constant 0 : index
    %2 = vector.load %arg6[%c0_3, %c0_4] : memref<128x128xbf16, #tpu.memory_space<vmem>>, vector<128x128xbf16>
    %c0_5 = arith.constant 0 : index
    %c0_6 = arith.constant 0 : index
    %c0_7 = arith.constant 0 : index
    %3 = vector.load %arg2[%c0_5, %c0_6, %c0_7] : memref<6x128x128xbf16, #tpu.memory_space<vmem>>, vector<1x128x128xbf16>
    %4 = vector.shape_cast %3 : vector<1x128x128xbf16> to vector<128x128xbf16>
    %cst = arith.constant dense<0.000000e+00> : vector<128x128xf32>
    %5 = tpu.matmul %2, %4, %cst {dimension_numbers = #tpu.dot_dimension_numbers<[1], [0], [0], [1], [0, 0, 1, 1], [], []>} : vector<128x128xbf16>, vector<128x128xbf16>, vector<128x128xf32> -> vector<128x128xf32>
    %6 = arith.truncf %5 : vector<128x128xf32> to vector<128x128xbf16>
    %c0_8 = arith.constant 0 : index
    %c0_9 = arith.constant 0 : index
    %7 = vector.load %arg7[%c0_8, %c0_9] : memref<128x128xbf16, #tpu.memory_space<vmem>>, vector<128x128xbf16>
    tpu.vector_store %arg7[%c0_8, %c0_9], %6 {strides = array<i32>} : memref<128x128xbf16, #tpu.memory_space<vmem>>, vector<128x128xbf16>,
    %c0_10 = arith.constant 0 : index
    %c0_11 = arith.constant 0 : index
    %c0_12 = arith.constant 0 : index
    %8 = vector.load %arg3[%c0_10, %c0_11, %c0_12] : memref<6x1x128xf32, #tpu.memory_space<vmem>>, vector<1x1x128xf32>
    %9 = vector.shape_cast %8 : vector<1x1x128xf32> to vector<1x128xf32>
    %c0_i32 = arith.constant 0 : i32
    %c0_i32_13 = arith.constant 0 : i32
    %c0_i32_14 = arith.constant 0 : i32
    %c0_i32_15 = arith.constant 0 : i32
    %10 = tpu.memref_slice %arg0[%c0_i32_14, %c0_i32_15] : memref<128x128xbf16, #tpu.memory_space<any>> -> memref<128x128xbf16, #tpu.memory_space<any>>
    %c0_i32_16 = arith.constant 0 : i32
    %c0_i32_17 = arith.constant 0 : i32
    %11 = tpu.memref_slice %arg5[%c0_i32, %c0_i32_16, %c0_i32_17] : memref<2x128x128xbf16, #tpu.memory_space<vmem>> -> memref<1x128x128xbf16, #tpu.memory_space<vmem>>
    %12 = tpu.memref_squeeze %11 : memref<1x128x128xbf16, #tpu.memory_space<vmem>> -> memref<128x128xbf16, #tpu.memory_space<vmem>>
    %13 = tpu.memref_slice %arg8[%c0_i32_13] : memref<2x!tpu.dma_semaphore, #tpu.memory_space<semaphore_mem>> -> memref<1x!tpu.dma_semaphore, #tpu.memory_space<semaphore_mem>>
    %14 = tpu.memref_squeeze %13 : memref<1x!tpu.dma_semaphore, #tpu.memory_space<semaphore_mem>> -> memref<!tpu.dma_semaphore, #tpu.memory_space<semaphore_mem>>
    tpu.enqueue_dma source(%10 : memref<128x128xbf16, #tpu.memory_space<any>>) target(%12 : memref<128x128xbf16, #tpu.memory_space<vmem>>) target_semaphore(%14 : memref<!tpu.dma_semaphore, #tpu.memory_space<semaphore_mem>>)
    %c0_i32_18 = arith.constant 0 : i32
    %c1_i32 = arith.constant 1 : i32
    %15 = arith.muli %c0_i32_18, %c1_i32 : i32
    %c0_i32_19 = arith.constant 0 : i32
    %16 = arith.addi %c0_i32_19, %15 : i32
    %c1_i32_20 = arith.constant 1 : i32
    %17 = arith.andi %16, %c1_i32_20 : i32
    %c0_i32_21 = arith.constant 0 : i32
    %c0_i32_22 = arith.constant 0 : i32
    %18 = tpu.memref_slice %arg0[%c0_i32_21, %c0_i32_22] : memref<128x128xbf16, #tpu.memory_space<any>> -> memref<128x128xbf16, #tpu.memory_space<any>>
    %c0_i32_23 = arith.constant 0 : i32
    %c0_i32_24 = arith.constant 0 : i32
    %19 = tpu.memref_slice %arg5[%17, %c0_i32_23, %c0_i32_24] : memref<2x128x128xbf16, #tpu.memory_space<vmem>> -> memref<1x128x128xbf16, #tpu.memory_space<vmem>>
    %20 = tpu.memref_squeeze %19 : memref<1x128x128xbf16, #tpu.memory_space<vmem>> -> memref<128x128xbf16, #tpu.memory_space<vmem>>
    %21 = tpu.memref_slice %arg8[%17] : memref<2x!tpu.dma_semaphore, #tpu.memory_space<semaphore_mem>> -> memref<1x!tpu.dma_semaphore, #tpu.memory_space<semaphore_mem>>
    %22 = tpu.memref_squeeze %21 : memref<1x!tpu.dma_semaphore, #tpu.memory_space<semaphore_mem>> -> memref<!tpu.dma_semaphore, #tpu.memory_space<semaphore_mem>>
    tpu.wait_dma2 semaphore(%22 : memref<!tpu.dma_semaphore, #tpu.memory_space<semaphore_mem>>) src(%18 : memref<128x128xbf16, #tpu.memory_space<any>>) dst(%20 : memref<128x128xbf16, #tpu.memory_space<vmem>>)
    %c1_i32_25 = arith.constant 1 : i32
    %23 = arith.addi %16, %c1_i32_25 : i32
    %c1_i32_26 = arith.constant 1 : i32
    %24 = arith.cmpi slt, %23, %c1_i32_26 : i32
    %25 = arith.extui %24 : i1 to i32
    %c0_i32_27 = arith.constant 0 : i32
    %26 = arith.cmpi ne, %25, %c0_i32_27 : i32
    scf.if %26 {
      %c1_i32_133 = arith.constant 1 : i32
      %150 = arith.addi %16, %c1_i32_133 : i32
      %c128_i32_134 = arith.constant 128 : i32
      %151 = arith.muli %150, %c128_i32_134 : i32
      %152 = tpu.assume_multiple %151, 128 : i32
      %c1_i32_135 = arith.constant 1 : i32
      %153 = arith.subi %c1_i32_135, %17 : i32
      %c0_i32_136 = arith.constant 0 : i32
      %154 = tpu.memref_slice %arg0[%152, %c0_i32_136] : memref<128x128xbf16, #tpu.memory_space<any>> -> memref<128x128xbf16, #tpu.memory_space<any>>
      %c0_i32_137 = arith.constant 0 : i32
      %c0_i32_138 = arith.constant 0 : i32
      %155 = tpu.memref_slice %arg5[%153, %c0_i32_137, %c0_i32_138] : memref<2x128x128xbf16, #tpu.memory_space<vmem>> -> memref<1x128x128xbf16, #tpu.memory_space<vmem>>
      %156 = tpu.memref_squeeze %155 : memref<1x128x128xbf16, #tpu.memory_space<vmem>> -> memref<128x128xbf16, #tpu.memory_space<vmem>>
      %157 = tpu.memref_slice %arg8[%153] : memref<2x!tpu.dma_semaphore, #tpu.memory_space<semaphore_mem>> -> memref<1x!tpu.dma_semaphore, #tpu.memory_space<semaphore_mem>>
      %158 = tpu.memref_squeeze %157 : memref<1x!tpu.dma_semaphore, #tpu.memory_space<semaphore_mem>> -> memref<!tpu.dma_semaphore, #tpu.memory_space<semaphore_mem>>
      tpu.enqueue_dma source(%154 : memref<128x128xbf16, #tpu.memory_space<any>>) target(%156 : memref<128x128xbf16, #tpu.memory_space<vmem>>) target_semaphore(%158 : memref<!tpu.dma_semaphore, #tpu.memory_space<semaphore_mem>>)
    } else {
    }
    %27 = arith.index_cast %17 : i32 to index
    %c0_28 = arith.constant 0 : index
    %c0_29 = arith.constant 0 : index
    %28 = vector.load %arg5[%27, %c0_28, %c0_29] : memref<2x128x128xbf16, #tpu.memory_space<vmem>>, vector<1x128x128xbf16>
    %29 = vector.shape_cast %28 : vector<1x128x128xbf16> to vector<128x128xbf16>
    %c0_30 = arith.constant 0 : index
    %c0_31 = arith.constant 0 : index
    %30 = vector.load %arg7[%c0_30, %c0_31] : memref<128x128xbf16, #tpu.memory_space<vmem>>, vector<128x128xbf16>
    %cst_32 = arith.constant dense<0.000000e+00> : vector<128x128xf32>
    %31 = tpu.matmul %29, %30, %cst_32 {dimension_numbers = #tpu.dot_dimension_numbers<[1], [0], [0], [1], [0, 0, 1, 1], [], []>} : vector<128x128xbf16>, vector<128x128xbf16>, vector<128x128xf32> -> vector<128x128xf32>
    %32 = vector.broadcast %9 : vector<1x128xf32> to vector<128x128xf32>
    %33 = arith.addf %31, %32 : vector<128x128xf32>
    %cst_33 = arith.constant 0.000000e+00 : f32
    %34 = vector.broadcast %cst_33 : f32 to vector<128x128xf32>
    %35 = arith.maximumf %33, %34 : vector<128x128xf32>
    %c128_i32 = arith.constant 128 : i32
    %36 = arith.muli %16, %c128_i32 : i32
    %37 = tpu.assume_multiple %36, 128 : i32
    %38 = arith.truncf %35 : vector<128x128xf32> to vector<128x128xbf16>
    %39 = arith.index_cast %37 : i32 to index
    %c0_34 = arith.constant 0 : index
    %40 = vector.load %arg6[%39, %c0_34] : memref<128x128xbf16, #tpu.memory_space<vmem>>, vector<128x128xbf16>
    tpu.vector_store %arg6[%39, %c0_34], %38 {strides = array<i32>} : memref<128x128xbf16, #tpu.memory_space<vmem>>, vector<128x128xbf16>,
    %c1_i32_35 = arith.constant 1 : i32
    %c0_36 = arith.constant 0 : index
    %c0_37 = arith.constant 0 : index
    %41 = vector.load %arg6[%c0_36, %c0_37] : memref<128x128xbf16, #tpu.memory_space<vmem>>, vector<128x128xbf16>
    %c1 = arith.constant 1 : index
    %c0_38 = arith.constant 0 : index
    %c0_39 = arith.constant 0 : index
    %42 = vector.load %arg2[%c1, %c0_38, %c0_39] : memref<6x128x128xbf16, #tpu.memory_space<vmem>>, vector<1x128x128xbf16>
    %43 = vector.shape_cast %42 : vector<1x128x128xbf16> to vector<128x128xbf16>
    %cst_40 = arith.constant dense<0.000000e+00> : vector<128x128xf32>
    %44 = tpu.matmul %41, %43, %cst_40 {dimension_numbers = #tpu.dot_dimension_numbers<[1], [0], [0], [1], [0, 0, 1, 1], [], []>} : vector<128x128xbf16>, vector<128x128xbf16>, vector<128x128xf32> -> vector<128x128xf32>
    %45 = arith.truncf %44 : vector<128x128xf32> to vector<128x128xbf16>
    %c0_41 = arith.constant 0 : index
    %c0_42 = arith.constant 0 : index
    %46 = vector.load %arg7[%c0_41, %c0_42] : memref<128x128xbf16, #tpu.memory_space<vmem>>, vector<128x128xbf16>
    tpu.vector_store %arg7[%c0_41, %c0_42], %45 {strides = array<i32>} : memref<128x128xbf16, #tpu.memory_space<vmem>>, vector<128x128xbf16>,
    %c1_43 = arith.constant 1 : index
    %c0_44 = arith.constant 0 : index
    %c0_45 = arith.constant 0 : index
    %47 = vector.load %arg3[%c1_43, %c0_44, %c0_45] : memref<6x1x128xf32, #tpu.memory_space<vmem>>, vector<1x1x128xf32>
    %48 = vector.shape_cast %47 : vector<1x1x128xf32> to vector<1x128xf32>
    %c0_i32_46 = arith.constant 0 : i32
    %c0_i32_47 = arith.constant 0 : i32
    %c0_i32_48 = arith.constant 0 : i32
    %c0_i32_49 = arith.constant 0 : i32
    %49 = tpu.memref_slice %arg0[%c0_i32_48, %c0_i32_49] : memref<128x128xbf16, #tpu.memory_space<any>> -> memref<128x128xbf16, #tpu.memory_space<any>>
    %c0_i32_50 = arith.constant 0 : i32
    %c0_i32_51 = arith.constant 0 : i32
    %50 = tpu.memref_slice %arg5[%c0_i32_46, %c0_i32_50, %c0_i32_51] : memref<2x128x128xbf16, #tpu.memory_space<vmem>> -> memref<1x128x128xbf16, #tpu.memory_space<vmem>>
    %51 = tpu.memref_squeeze %50 : memref<1x128x128xbf16, #tpu.memory_space<vmem>> -> memref<128x128xbf16, #tpu.memory_space<vmem>>
    %52 = tpu.memref_slice %arg8[%c0_i32_47] : memref<2x!tpu.dma_semaphore, #tpu.memory_space<semaphore_mem>> -> memref<1x!tpu.dma_semaphore, #tpu.memory_space<semaphore_mem>>
    %53 = tpu.memref_squeeze %52 : memref<1x!tpu.dma_semaphore, #tpu.memory_space<semaphore_mem>> -> memref<!tpu.dma_semaphore, #tpu.memory_space<semaphore_mem>>
    tpu.enqueue_dma source(%49 : memref<128x128xbf16, #tpu.memory_space<any>>) target(%51 : memref<128x128xbf16, #tpu.memory_space<vmem>>) target_semaphore(%53 : memref<!tpu.dma_semaphore, #tpu.memory_space<semaphore_mem>>)
    %c0_i32_52 = arith.constant 0 : i32
    %c1_i32_53 = arith.constant 1 : i32
    %54 = arith.muli %c0_i32_52, %c1_i32_53 : i32
    %c0_i32_54 = arith.constant 0 : i32
    %55 = arith.addi %c0_i32_54, %54 : i32
    %c1_i32_55 = arith.constant 1 : i32
    %56 = arith.andi %55, %c1_i32_55 : i32
    %c0_i32_56 = arith.constant 0 : i32
    %c0_i32_57 = arith.constant 0 : i32
    %57 = tpu.memref_slice %arg0[%c0_i32_56, %c0_i32_57] : memref<128x128xbf16, #tpu.memory_space<any>> -> memref<128x128xbf16, #tpu.memory_space<any>>
    %c0_i32_58 = arith.constant 0 : i32
    %c0_i32_59 = arith.constant 0 : i32
    %58 = tpu.memref_slice %arg5[%56, %c0_i32_58, %c0_i32_59] : memref<2x128x128xbf16, #tpu.memory_space<vmem>> -> memref<1x128x128xbf16, #tpu.memory_space<vmem>>
    %59 = tpu.memref_squeeze %58 : memref<1x128x128xbf16, #tpu.memory_space<vmem>> -> memref<128x128xbf16, #tpu.memory_space<vmem>>
    %60 = tpu.memref_slice %arg8[%56] : memref<2x!tpu.dma_semaphore, #tpu.memory_space<semaphore_mem>> -> memref<1x!tpu.dma_semaphore, #tpu.memory_space<semaphore_mem>>
    %61 = tpu.memref_squeeze %60 : memref<1x!tpu.dma_semaphore, #tpu.memory_space<semaphore_mem>> -> memref<!tpu.dma_semaphore, #tpu.memory_space<semaphore_mem>>
    tpu.wait_dma2 semaphore(%61 : memref<!tpu.dma_semaphore, #tpu.memory_space<semaphore_mem>>) src(%57 : memref<128x128xbf16, #tpu.memory_space<any>>) dst(%59 : memref<128x128xbf16, #tpu.memory_space<vmem>>)
    %c1_i32_60 = arith.constant 1 : i32
    %62 = arith.addi %55, %c1_i32_60 : i32
    %c1_i32_61 = arith.constant 1 : i32
    %63 = arith.cmpi slt, %62, %c1_i32_61 : i32
    %64 = arith.extui %63 : i1 to i32
    %c0_i32_62 = arith.constant 0 : i32
    %65 = arith.cmpi ne, %64, %c0_i32_62 : i32
    scf.if %65 {
      %c1_i32_133 = arith.constant 1 : i32
      %150 = arith.addi %55, %c1_i32_133 : i32
      %c128_i32_134 = arith.constant 128 : i32
      %151 = arith.muli %150, %c128_i32_134 : i32
      %152 = tpu.assume_multiple %151, 128 : i32
      %c1_i32_135 = arith.constant 1 : i32
      %153 = arith.subi %c1_i32_135, %56 : i32
      %c0_i32_136 = arith.constant 0 : i32
      %154 = tpu.memref_slice %arg0[%152, %c0_i32_136] : memref<128x128xbf16, #tpu.memory_space<any>> -> memref<128x128xbf16, #tpu.memory_space<any>>
      %c0_i32_137 = arith.constant 0 : i32
      %c0_i32_138 = arith.constant 0 : i32
      %155 = tpu.memref_slice %arg5[%153, %c0_i32_137, %c0_i32_138] : memref<2x128x128xbf16, #tpu.memory_space<vmem>> -> memref<1x128x128xbf16, #tpu.memory_space<vmem>>
      %156 = tpu.memref_squeeze %155 : memref<1x128x128xbf16, #tpu.memory_space<vmem>> -> memref<128x128xbf16, #tpu.memory_space<vmem>>
      %157 = tpu.memref_slice %arg8[%153] : memref<2x!tpu.dma_semaphore, #tpu.memory_space<semaphore_mem>> -> memref<1x!tpu.dma_semaphore, #tpu.memory_space<semaphore_mem>>
      %158 = tpu.memref_squeeze %157 : memref<1x!tpu.dma_semaphore, #tpu.memory_space<semaphore_mem>> -> memref<!tpu.dma_semaphore, #tpu.memory_space<semaphore_mem>>
      tpu.enqueue_dma source(%154 : memref<128x128xbf16, #tpu.memory_space<any>>) target(%156 : memref<128x128xbf16, #tpu.memory_space<vmem>>) target_semaphore(%158 : memref<!tpu.dma_semaphore, #tpu.memory_space<semaphore_mem>>)
    } else {
    }
    %66 = arith.index_cast %56 : i32 to index
    %c0_63 = arith.constant 0 : index
    %c0_64 = arith.constant 0 : index
    %67 = vector.load %arg5[%66, %c0_63, %c0_64] : memref<2x128x128xbf16, #tpu.memory_space<vmem>>, vector<1x128x128xbf16>
    %68 = vector.shape_cast %67 : vector<1x128x128xbf16> to vector<128x128xbf16>
    %c0_65 = arith.constant 0 : index
    %c0_66 = arith.constant 0 : index
    %69 = vector.load %arg7[%c0_65, %c0_66] : memref<128x128xbf16, #tpu.memory_space<vmem>>, vector<128x128xbf16>
    %cst_67 = arith.constant dense<0.000000e+00> : vector<128x128xf32>
    %70 = tpu.matmul %68, %69, %cst_67 {dimension_numbers = #tpu.dot_dimension_numbers<[1], [0], [0], [1], [0, 0, 1, 1], [], []>} : vector<128x128xbf16>, vector<128x128xbf16>, vector<128x128xf32> -> vector<128x128xf32>
    %71 = vector.broadcast %48 : vector<1x128xf32> to vector<128x128xf32>
    %72 = arith.addf %70, %71 : vector<128x128xf32>
    %cst_68 = arith.constant 0.000000e+00 : f32
    %73 = vector.broadcast %cst_68 : f32 to vector<128x128xf32>
    %74 = arith.maximumf %72, %73 : vector<128x128xf32>
    %c128_i32_69 = arith.constant 128 : i32
    %75 = arith.muli %55, %c128_i32_69 : i32
    %76 = tpu.assume_multiple %75, 128 : i32
    %77 = arith.truncf %74 : vector<128x128xf32> to vector<128x128xbf16>
    %78 = arith.index_cast %76 : i32 to index
    %c0_70 = arith.constant 0 : index
    %79 = vector.load %arg6[%78, %c0_70] : memref<128x128xbf16, #tpu.memory_space<vmem>>, vector<128x128xbf16>
    tpu.vector_store %arg6[%78, %c0_70], %77 {strides = array<i32>} : memref<128x128xbf16, #tpu.memory_space<vmem>>, vector<128x128xbf16>,
    %c1_i32_71 = arith.constant 1 : i32
    %c0_72 = arith.constant 0 : index
    %c0_73 = arith.constant 0 : index
    %80 = vector.load %arg6[%c0_72, %c0_73] : memref<128x128xbf16, #tpu.memory_space<vmem>>, vector<128x128xbf16>
    %c2 = arith.constant 2 : index
    %c0_74 = arith.constant 0 : index
    %c0_75 = arith.constant 0 : index
    %81 = vector.load %arg2[%c2, %c0_74, %c0_75] : memref<6x128x128xbf16, #tpu.memory_space<vmem>>, vector<1x128x128xbf16>
    %82 = vector.shape_cast %81 : vector<1x128x128xbf16> to vector<128x128xbf16>
    %cst_76 = arith.constant dense<0.000000e+00> : vector<128x128xf32>
    %83 = tpu.matmul %80, %82, %cst_76 {dimension_numbers = #tpu.dot_dimension_numbers<[1], [0], [0], [1], [0, 0, 1, 1], [], []>} : vector<128x128xbf16>, vector<128x128xbf16>, vector<128x128xf32> -> vector<128x128xf32>
    %84 = arith.truncf %83 : vector<128x128xf32> to vector<128x128xbf16>
    %c0_77 = arith.constant 0 : index
    %c0_78 = arith.constant 0 : index
    %85 = vector.load %arg7[%c0_77, %c0_78] : memref<128x128xbf16, #tpu.memory_space<vmem>>, vector<128x128xbf16>
    tpu.vector_store %arg7[%c0_77, %c0_78], %84 {strides = array<i32>} : memref<128x128xbf16, #tpu.memory_space<vmem>>, vector<128x128xbf16>,
    %c2_79 = arith.constant 2 : index
    %c0_80 = arith.constant 0 : index
    %c0_81 = arith.constant 0 : index
    %86 = vector.load %arg3[%c2_79, %c0_80, %c0_81] : memref<6x1x128xf32, #tpu.memory_space<vmem>>, vector<1x1x128xf32>
    %87 = vector.shape_cast %86 : vector<1x1x128xf32> to vector<1x128xf32>
    %c0_i32_82 = arith.constant 0 : i32
    %c0_i32_83 = arith.constant 0 : i32
    %c0_i32_84 = arith.constant 0 : i32
    %c0_i32_85 = arith.constant 0 : i32
    %88 = tpu.memref_slice %arg0[%c0_i32_84, %c0_i32_85] : memref<128x128xbf16, #tpu.memory_space<any>> -> memref<128x128xbf16, #tpu.memory_space<any>>
    %c0_i32_86 = arith.constant 0 : i32
    %c0_i32_87 = arith.constant 0 : i32
    %89 = tpu.memref_slice %arg5[%c0_i32_82, %c0_i32_86, %c0_i32_87] : memref<2x128x128xbf16, #tpu.memory_space<vmem>> -> memref<1x128x128xbf16, #tpu.memory_space<vmem>>
    %90 = tpu.memref_squeeze %89 : memref<1x128x128xbf16, #tpu.memory_space<vmem>> -> memref<128x128xbf16, #tpu.memory_space<vmem>>
    %91 = tpu.memref_slice %arg8[%c0_i32_83] : memref<2x!tpu.dma_semaphore, #tpu.memory_space<semaphore_mem>> -> memref<1x!tpu.dma_semaphore, #tpu.memory_space<semaphore_mem>>
    %92 = tpu.memref_squeeze %91 : memref<1x!tpu.dma_semaphore, #tpu.memory_space<semaphore_mem>> -> memref<!tpu.dma_semaphore, #tpu.memory_space<semaphore_mem>>
    tpu.enqueue_dma source(%88 : memref<128x128xbf16, #tpu.memory_space<any>>) target(%90 : memref<128x128xbf16, #tpu.memory_space<vmem>>) target_semaphore(%92 : memref<!tpu.dma_semaphore, #tpu.memory_space<semaphore_mem>>)
    %c0_i32_88 = arith.constant 0 : i32
    %c1_i32_89 = arith.constant 1 : i32
    %93 = arith.muli %c0_i32_88, %c1_i32_89 : i32
    %c0_i32_90 = arith.constant 0 : i32
    %94 = arith.addi %c0_i32_90, %93 : i32
    %c1_i32_91 = arith.constant 1 : i32
    %95 = arith.andi %94, %c1_i32_91 : i32
    %c0_i32_92 = arith.constant 0 : i32
    %c0_i32_93 = arith.constant 0 : i32
    %96 = tpu.memref_slice %arg0[%c0_i32_92, %c0_i32_93] : memref<128x128xbf16, #tpu.memory_space<any>> -> memref<128x128xbf16, #tpu.memory_space<any>>
    %c0_i32_94 = arith.constant 0 : i32
    %c0_i32_95 = arith.constant 0 : i32
    %97 = tpu.memref_slice %arg5[%95, %c0_i32_94, %c0_i32_95] : memref<2x128x128xbf16, #tpu.memory_space<vmem>> -> memref<1x128x128xbf16, #tpu.memory_space<vmem>>
    %98 = tpu.memref_squeeze %97 : memref<1x128x128xbf16, #tpu.memory_space<vmem>> -> memref<128x128xbf16, #tpu.memory_space<vmem>>
    %99 = tpu.memref_slice %arg8[%95] : memref<2x!tpu.dma_semaphore, #tpu.memory_space<semaphore_mem>> -> memref<1x!tpu.dma_semaphore, #tpu.memory_space<semaphore_mem>>
    %100 = tpu.memref_squeeze %99 : memref<1x!tpu.dma_semaphore, #tpu.memory_space<semaphore_mem>> -> memref<!tpu.dma_semaphore, #tpu.memory_space<semaphore_mem>>
    tpu.wait_dma2 semaphore(%100 : memref<!tpu.dma_semaphore, #tpu.memory_space<semaphore_mem>>) src(%96 : memref<128x128xbf16, #tpu.memory_space<any>>) dst(%98 : memref<128x128xbf16, #tpu.memory_space<vmem>>)
    %c1_i32_96 = arith.constant 1 : i32
    %101 = arith.addi %94, %c1_i32_96 : i32
    %c1_i32_97 = arith.constant 1 : i32
    %102 = arith.cmpi slt, %101, %c1_i32_97 : i32
    %103 = arith.extui %102 : i1 to i32
    %c0_i32_98 = arith.constant 0 : i32
    %104 = arith.cmpi ne, %103, %c0_i32_98 : i32
    scf.if %104 {
      %c1_i32_133 = arith.constant 1 : i32
      %150 = arith.addi %94, %c1_i32_133 : i32
      %c128_i32_134 = arith.constant 128 : i32
      %151 = arith.muli %150, %c128_i32_134 : i32
      %152 = tpu.assume_multiple %151, 128 : i32
      %c1_i32_135 = arith.constant 1 : i32
      %153 = arith.subi %c1_i32_135, %95 : i32
      %c0_i32_136 = arith.constant 0 : i32
      %154 = tpu.memref_slice %arg0[%152, %c0_i32_136] : memref<128x128xbf16, #tpu.memory_space<any>> -> memref<128x128xbf16, #tpu.memory_space<any>>
      %c0_i32_137 = arith.constant 0 : i32
      %c0_i32_138 = arith.constant 0 : i32
      %155 = tpu.memref_slice %arg5[%153, %c0_i32_137, %c0_i32_138] : memref<2x128x128xbf16, #tpu.memory_space<vmem>> -> memref<1x128x128xbf16, #tpu.memory_space<vmem>>
      %156 = tpu.memref_squeeze %155 : memref<1x128x128xbf16, #tpu.memory_space<vmem>> -> memref<128x128xbf16, #tpu.memory_space<vmem>>
      %157 = tpu.memref_slice %arg8[%153] : memref<2x!tpu.dma_semaphore, #tpu.memory_space<semaphore_mem>> -> memref<1x!tpu.dma_semaphore, #tpu.memory_space<semaphore_mem>>
      %158 = tpu.memref_squeeze %157 : memref<1x!tpu.dma_semaphore, #tpu.memory_space<semaphore_mem>> -> memref<!tpu.dma_semaphore, #tpu.memory_space<semaphore_mem>>
      tpu.enqueue_dma source(%154 : memref<128x128xbf16, #tpu.memory_space<any>>) target(%156 : memref<128x128xbf16, #tpu.memory_space<vmem>>) target_semaphore(%158 : memref<!tpu.dma_semaphore, #tpu.memory_space<semaphore_mem>>)
    } else {
    }
    %105 = arith.index_cast %95 : i32 to index
    %c0_99 = arith.constant 0 : index
    %c0_100 = arith.constant 0 : index
    %106 = vector.load %arg5[%105, %c0_99, %c0_100] : memref<2x128x128xbf16, #tpu.memory_space<vmem>>, vector<1x128x128xbf16>
    %107 = vector.shape_cast %106 : vector<1x128x128xbf16> to vector<128x128xbf16>
    %c0_101 = arith.constant 0 : index
    %c0_102 = arith.constant 0 : index
    %108 = vector.load %arg7[%c0_101, %c0_102] : memref<128x128xbf16, #tpu.memory_space<vmem>>, vector<128x128xbf16>
    %cst_103 = arith.constant dense<0.000000e+00> : vector<128x128xf32>
    %109 = tpu.matmul %107, %108, %cst_103 {dimension_numbers = #tpu.dot_dimension_numbers<[1], [0], [0], [1], [0, 0, 1, 1], [], []>} : vector<128x128xbf16>, vector<128x128xbf16>, vector<128x128xf32> -> vector<128x128xf32>
    %110 = vector.broadcast %87 : vector<1x128xf32> to vector<128x128xf32>
    %111 = arith.addf %109, %110 : vector<128x128xf32>
    %cst_104 = arith.constant 0.000000e+00 : f32
    %112 = vector.broadcast %cst_104 : f32 to vector<128x128xf32>
    %113 = arith.maximumf %111, %112 : vector<128x128xf32>
    %c128_i32_105 = arith.constant 128 : i32
    %114 = arith.muli %94, %c128_i32_105 : i32
    %115 = tpu.assume_multiple %114, 128 : i32
    %116 = arith.truncf %113 : vector<128x128xf32> to vector<128x128xbf16>
    %117 = arith.index_cast %115 : i32 to index
    %c0_106 = arith.constant 0 : index
    %118 = vector.load %arg6[%117, %c0_106] : memref<128x128xbf16, #tpu.memory_space<vmem>>, vector<128x128xbf16>
    tpu.vector_store %arg6[%117, %c0_106], %116 {strides = array<i32>} : memref<128x128xbf16, #tpu.memory_space<vmem>>, vector<128x128xbf16>,
    %c1_i32_107 = arith.constant 1 : i32
    %c0_108 = arith.constant 0 : index
    %c0_109 = arith.constant 0 : index
    %119 = vector.load %arg6[%c0_108, %c0_109] : memref<128x128xbf16, #tpu.memory_space<vmem>>, vector<128x128xbf16>
    %c3 = arith.constant 3 : index
    %c0_110 = arith.constant 0 : index
    %c0_111 = arith.constant 0 : index
    %120 = vector.load %arg2[%c3, %c0_110, %c0_111] : memref<6x128x128xbf16, #tpu.memory_space<vmem>>, vector<1x128x128xbf16>
    %121 = vector.shape_cast %120 : vector<1x128x128xbf16> to vector<128x128xbf16>
    %cst_112 = arith.constant dense<0.000000e+00> : vector<128x128xf32>
    %122 = tpu.matmul %119, %121, %cst_112 {dimension_numbers = #tpu.dot_dimension_numbers<[1], [0], [0], [1], [0, 0, 1, 1], [], []>} : vector<128x128xbf16>, vector<128x128xbf16>, vector<128x128xf32> -> vector<128x128xf32>
    %c3_113 = arith.constant 3 : index
    %c0_114 = arith.constant 0 : index
    %c0_115 = arith.constant 0 : index
    %123 = vector.load %arg3[%c3_113, %c0_114, %c0_115] : memref<6x1x128xf32, #tpu.memory_space<vmem>>, vector<1x1x128xf32>
    %124 = vector.shape_cast %123 : vector<1x1x128xf32> to vector<1x128xf32>
    %125 = vector.broadcast %124 : vector<1x128xf32> to vector<128x128xf32>
    %126 = arith.addf %122, %125 : vector<128x128xf32>
    %cst_116 = arith.constant 0.000000e+00 : f32
    %127 = vector.broadcast %cst_116 : f32 to vector<128x128xf32>
    %128 = arith.maximumf %126, %127 : vector<128x128xf32>
    %129 = arith.truncf %128 : vector<128x128xf32> to vector<128x128xbf16>
    %c4 = arith.constant 4 : index
    %c0_117 = arith.constant 0 : index
    %c0_118 = arith.constant 0 : index
    %130 = vector.load %arg2[%c4, %c0_117, %c0_118] : memref<6x128x128xbf16, #tpu.memory_space<vmem>>, vector<1x128x128xbf16>
    %131 = vector.shape_cast %130 : vector<1x128x128xbf16> to vector<128x128xbf16>
    %cst_119 = arith.constant dense<0.000000e+00> : vector<128x128xf32>
    %132 = tpu.matmul %129, %131, %cst_119 {dimension_numbers = #tpu.dot_dimension_numbers<[1], [0], [0], [1], [0, 0, 1, 1], [], []>} : vector<128x128xbf16>, vector<128x128xbf16>, vector<128x128xf32> -> vector<128x128xf32>
    %c4_120 = arith.constant 4 : index
    %c0_121 = arith.constant 0 : index
    %c0_122 = arith.constant 0 : index
    %133 = vector.load %arg3[%c4_120, %c0_121, %c0_122] : memref<6x1x128xf32, #tpu.memory_space<vmem>>, vector<1x1x128xf32>
    %134 = vector.shape_cast %133 : vector<1x1x128xf32> to vector<1x128xf32>
    %135 = vector.broadcast %134 : vector<1x128xf32> to vector<128x128xf32>
    %136 = arith.addf %132, %135 : vector<128x128xf32>
    %cst_123 = arith.constant 0.000000e+00 : f32
    %137 = vector.broadcast %cst_123 : f32 to vector<128x128xf32>
    %138 = arith.maximumf %136, %137 : vector<128x128xf32>
    %139 = arith.truncf %138 : vector<128x128xf32> to vector<128x128xbf16>
    %c5 = arith.constant 5 : index
    %c0_124 = arith.constant 0 : index
    %c0_125 = arith.constant 0 : index
    %140 = vector.load %arg2[%c5, %c0_124, %c0_125] : memref<6x128x128xbf16, #tpu.memory_space<vmem>>, vector<1x128x128xbf16>
    %141 = vector.shape_cast %140 : vector<1x128x128xbf16> to vector<128x128xbf16>
    %cst_126 = arith.constant dense<0.000000e+00> : vector<128x128xf32>
    %142 = tpu.matmul %139, %141, %cst_126 {dimension_numbers = #tpu.dot_dimension_numbers<[1], [0], [0], [1], [0, 0, 1, 1], [], []>} : vector<128x128xbf16>, vector<128x128xbf16>, vector<128x128xf32> -> vector<128x128xf32>
    %c5_127 = arith.constant 5 : index
    %c0_128 = arith.constant 0 : index
    %c0_129 = arith.constant 0 : index
    %143 = vector.load %arg3[%c5_127, %c0_128, %c0_129] : memref<6x1x128xf32, #tpu.memory_space<vmem>>, vector<1x1x128xf32>
    %144 = vector.shape_cast %143 : vector<1x1x128xf32> to vector<1x128xf32>
    %145 = vector.broadcast %144 : vector<1x128xf32> to vector<128x128xf32>
    %146 = arith.addf %142, %145 : vector<128x128xf32>
    %cst_130 = arith.constant 0.000000e+00 : f32
    %147 = vector.broadcast %cst_130 : f32 to vector<128x128xf32>
    %148 = arith.maximumf %146, %147 : vector<128x128xf32>
    %c0_131 = arith.constant 0 : index
    %c0_132 = arith.constant 0 : index
    %149 = vector.load %arg4[%c0_131, %c0_132] : memref<128x128xf32, #tpu.memory_space<vmem>>, vector<128x128xf32>
    tpu.vector_store %arg4[%c0_131, %c0_132], %148 {strides = array<i32>} : memref<128x128xf32, #tpu.memory_space<vmem>>, vector<128x128xf32>,
    return
  }
}

</mosaic_0001>

<bundles_post_ra>
// kernel: graphconv_forward.1
= control target key start
LH: loop header
LB: loop body
LE: loop exit
PB: predicated region body
PF: predicated region fallthrough
CT: control target
= control target key end

     0   :  { %s4493_s2 = inlined_call_operand.vmem [shape: bf16[6,128,128], index: 2, kind: input, shape index: {}]   ;;  %s4494_s3 = inlined_call_operand.vmem [shape: f32[6,1,128], index: 3, kind: input, shape index: {}]   ;;  %s4495_s4 = inlined_call_operand.vmem [shape: f32[128,128], index: 4, kind: output, shape index: {}]   ;;  %s4496_s1 = inlined_call_operand.vmem [shape: bf16[128,128], index: 1, kind: input, shape index: {}]   ;;  %s4497_s0 = inlined_call_operand.vmem [shape: bf16[128,128], index: 0, kind: input, shape index: {}]  }
   0x1   :  { %v3968_v0 = vld [vmem:[%s4493_s2 + $0x38] sm:$0xff]   ;;  %v3969_v1 = vld [vmem:[%s4493_s2 + $0x30] sm:$0xff]   ;;  %v3970_v2 = vld [vmem:[%s4493_s2 + $0x28] sm:$0xff]  }
   0x2   :  { %3664 = vmatprep.subr.bf16.mxu0 %v3968_v0  ;;  %v3971_v3 = vld [vmem:[%s4493_s2 + $0x20] sm:$0xff]   ;;  %v18_v5 = vld [vmem:[%s4496_s1 + $0x8] sm:$0xff]   ;;  %v20_v6 = vld [vmem:[%s4496_s1 + $0x10] sm:$0xff]  }
   0x3   :  { %3665 = vmatpush3.bf16.msra.mxu0 %v3968_v0  ;;  %v16_v4 = vld [vmem:[%s4496_s1] sm:$0xff]   ;;  %34 = vst [vmem:[#allocation3 + $0x8] sm:$0xff] %v18_v5   ;;  %36 = vst [vmem:[#allocation3 + $0x10] sm:$0xff] %v20_v6   ;;  %v22_v7 = vld [vmem:[%s4496_s1 + $0x18] sm:$0xff]  }
   0x4   :  { %3666 = vmatprep.subr.bf16.mxu0 %v3969_v1  ;;  %32 = vst [vmem:[#allocation3] sm:$0xff] %v16_v4   ;;  %v24_v8 = vld [vmem:[%s4496_s1 + $0x20] sm:$0xff]   ;;  %v26_v9 = vld [vmem:[%s4496_s1 + $0x28] sm:$0xff]   ;;  %38 = vst [vmem:[#allocation3 + $0x18] sm:$0xff] %v22_v7  }
   0x5   :  { %40 = vst [vmem:[#allocation3 + $0x20] sm:$0xff] %v24_v8   ;;  %42 = vst [vmem:[#allocation3 + $0x28] sm:$0xff] %v26_v9   ;;  %v28_v10 = vld [vmem:[%s4496_s1 + $0x30] sm:$0xff]   ;;  %v30_v11 = vld [vmem:[%s4496_s1 + $0x38] sm:$0xff]  }
   0x6   :  { %44 = vst [vmem:[#allocation3 + $0x30] sm:$0xff] %v28_v10   ;;  %46 = vst [vmem:[#allocation3 + $0x38] sm:$0xff] %v30_v11   ;;  %v3972_v12 = vld [vmem:[%s4493_s2 + $0x18] sm:$0xff]   ;;  %v3973_v13 = vld [vmem:[%s4493_s2 + $0x10] sm:$0xff]  }
   0x7   :  { %3667 = vmatpush3.bf16.msra.mxu0 %v3969_v1  ;;  %v3974_v15 = vld [vmem:[%s4493_s2 + $0x8] sm:$0xff]   ;;  %v3975_v16 = vld [vmem:[%s4493_s2] sm:$0xff]   ;;  %v391_v26 = vld [vmem:[%s4497_s0 + $0x10] sm:$0xff] }
   0x8   :  { %3668 = vmatprep.subr.bf16.mxu0 %v3970_v2  ;;  %v387_v24 = vld [vmem:[%s4497_s0] sm:$0xff]  ;;  %v389_v25 = vld [vmem:[%s4497_s0 + $0x8] sm:$0xff]  ;;  %392 = vst [vmem:[#allocation2 + $0x10] sm:$0xff] %v391_v26  ;;  %v393_v27 = vld [vmem:[%s4497_s0 + $0x18] sm:$0xff] }
   0x9   :  { %388 = vst [vmem:[#allocation2] sm:$0xff] %v387_v24  ;;  %390 = vst [vmem:[#allocation2 + $0x8] sm:$0xff] %v389_v25  ;;  %v395_v28 = vld [vmem:[%s4497_s0 + $0x20] sm:$0xff]  ;;  %v397_v29 = vld [vmem:[%s4497_s0 + $0x28] sm:$0xff] }
   0xa   :  { %v3977_v17 = vld [vmem:[#allocation3 + $0x8] sm:$0xff]   ;;  %v3978_v18 = vld [vmem:[#allocation3 + $0x10] sm:$0xff]   ;;  %394 = vst [vmem:[#allocation2 + $0x18] sm:$0xff] %v393_v27  ;;  %396 = vst [vmem:[#allocation2 + $0x20] sm:$0xff] %v395_v28 }
   0xb   :  { %3669 = vmatpush3.bf16.msra.mxu0 %v3970_v2  ;;  %v3976_v14 = vld [vmem:[#allocation3] sm:$0xff]   ;;  %v3979_v19 = vld [vmem:[#allocation3 + $0x18] sm:$0xff]   ;;  %398 = vst [vmem:[#allocation2 + $0x28] sm:$0xff] %v397_v29  ;;  %v399_v30 = vld [vmem:[%s4497_s0 + $0x30] sm:$0xff] }
   0xc   :  { %3670 = vmatprep.subr.bf16.mxu0 %v3971_v3  ;;  %3680 = vmatprep.mubr.bf16.mxu0 %v3976_v14  ;;  %v3980_v20 = vld [vmem:[#allocation3 + $0x20] sm:$0xff]   ;;  %v3981_v21 = vld [vmem:[#allocation3 + $0x28] sm:$0xff]   ;;  %v401_v31 = vld [vmem:[%s4497_s0 + $0x38] sm:$0xff]  ;;  %400 = vst [vmem:[#allocation2 + $0x30] sm:$0xff] %v399_v30 }
   0xd   :  { %v3982_v22 = vld [vmem:[#allocation3 + $0x30] sm:$0xff]   ;;  %v3983_v23 = vld [vmem:[#allocation3 + $0x38] sm:$0xff]   ;;  %402 = vst [vmem:[#allocation2 + $0x38] sm:$0xff] %v401_v31 }
   0xf   :  { %3671 = vmatpush3.bf16.msra.mxu0 %v3971_v3 }
  0x10   :  { %3672 = vmatprep.subr.bf16.mxu0 %v3972_v12 }
  0x13   :  { %3673 = vmatpush3.bf16.msra.mxu0 %v3972_v12 }
  0x14   :  { %3674 = vmatprep.subr.bf16.mxu0 %v3973_v13 }
  0x17   :  { %3675 = vmatpush3.bf16.msra.mxu0 %v3973_v13 }
  0x18   :  { %3676 = vmatprep.subr.bf16.mxu0 %v3974_v15 }
  0x1b   :  { %3677 = vmatpush3.bf16.msra.mxu0 %v3974_v15 }
  0x1c   :  { %3678 = vmatprep.subr.bf16.mxu0 %v3975_v16 }
  0x1f   :  { %3679 = vmatpush3.bf16.msra.mxu0 %v3975_v16 }
  0x22   :  { %3681 = vmatmul.mubr.bf16.vlgmr.msra.gmra.mxu0 %v3977_v17 }
  0x23   :  { %3684 = vmatprep.mubr.bf16.mxu0 %v3978_v18 }
  0x2a   :  { %3685 = vmatmul.mubr.bf16.gmra.mxu0 %v3979_v19 }
  0x2b   :  { %3688 = vmatprep.mubr.bf16.mxu0 %v3980_v20 }
  0x32   :  { %3689 = vmatmul.mubr.bf16.gmra.mxu0 %v3981_v21 }
  0x33   :  { %3692 = vmatprep.mubr.bf16.mxu0 %v3982_v22 }
  0x3a   :  { %3693 = vmatmul.mubr.bf16.gmra.mxu0 %v3983_v23 }
  0xe2   :  { %v3682_v32 = vpop.f32.mrf.mxu0 }
  0xe4   :  { %v210_v33 = vpop.f32.mrf.mxu0 }
  0xe6   :  { %v3683_v34 = vpop.f32.mrf.mxu0 }
  0xe7   :  { %v3246_v35 = vpack.c.bf16 %v3683_v34, %v3682_v32 }
  0xe8   :  { %v213_v36 = vpop.f32.mrf.mxu0 }
  0xe9   :  { %3478 = vst [vmem:[#allocation4 + $0x8] sm:$0xff] %v3246_v35   ;;  %v3241_v37 = vpack.c.bf16 %v213_v36, %v210_v33 }
  0xea   :  { %v3686_v38 = vpop.f32.mrf.mxu0 }
  0xeb   :  { %3242 = vst [vmem:[#allocation4] sm:$0xff] %v3241_v37  }
  0xec   :  { %v226_v39 = vpop.f32.mrf.mxu0 }
  0xee   :  { %v3687_v40 = vpop.f32.mrf.mxu0 }
  0xef   :  { %v3256_v41 = vpack.c.bf16 %v3687_v40, %v3686_v38 }
  0xf0   :  { %v229_v42 = vpop.f32.mrf.mxu0 }
  0xf1   :  { %3480 = vst [vmem:[#allocation4 + $0x18] sm:$0xff] %v3256_v41   ;;  %v3251_v43 = vpack.c.bf16 %v229_v42, %v226_v39 }
  0xf2   :  { %v3690_v44 = vpop.f32.mrf.mxu0 }
  0xf3   :  { %3479 = vst [vmem:[#allocation4 + $0x10] sm:$0xff] %v3251_v43  }
  0xf4   :  { %v242_v45 = vpop.f32.mrf.mxu0 }
  0xf6   :  { %v3691_v46 = vpop.f32.mrf.mxu0 }
  0xf7   :  { %v3266_v47 = vpack.c.bf16 %v3691_v46, %v3690_v44 }
  0xf8   :  { %v245_v48 = vpop.f32.mrf.mxu0 }
  0xf9   :  { %3482 = vst [vmem:[#allocation4 + $0x28] sm:$0xff] %v3266_v47   ;;  %v3261_v49 = vpack.c.bf16 %v245_v48, %v242_v45 }
  0xfa   :  { %v3694_v50 = vpop.f32.mrf.mxu0 }
  0xfb   :  { %3481 = vst [vmem:[#allocation4 + $0x20] sm:$0xff] %v3261_v49  }
  0xfc   :  { %v258_v51 = vpop.f32.mrf.mxu0 }
  0xfe   :  { %v3695_v52 = vpop.f32.mrf.mxu0 }
  0xff   :  { %v3276_v53 = vpack.c.bf16 %v3695_v52, %v3694_v50 }
 0x100   :  { %v261_v54 = vpop.f32.mrf.mxu0 }
 0x101   :  { %3484 = vst [vmem:[#allocation4 + $0x38] sm:$0xff] %v3276_v53   ;;  %v3271_v55 = vpack.c.bf16 %v261_v54, %v258_v51 }
 0x103   :  { %3483 = vst [vmem:[#allocation4 + $0x30] sm:$0xff] %v3271_v55  }
 0x104   :  { %410 = vsyncadd [#allocation5], 1024 }
 0x105   :  { %4096 = dma.done.wait [#allocation5], 1024 }
 0x106   :  { %4097 = vsyncadd [#allocation5], 4294966272  ;;  %v3986_v58 = vld [vmem:[#allocation4 + $0x28] sm:$0xff]   ;;  %v3987_v59 = vld [vmem:[#allocation4 + $0x20] sm:$0xff]  }
 0x107   :  { %v3992_v60 = vld [vmem:[#allocation2] sm:$0xff]   ;;  %v3988_v62 = vld [vmem:[#allocation4 + $0x18] sm:$0xff]   ;;  %v3993_v63 = vld [vmem:[#allocation2 + $0x8] sm:$0xff]  }
 0x108   :  { %v3984_v56 = vld [vmem:[#allocation4 + $0x38] sm:$0xff]   ;;  %v1083_v61 = vld [vmem:[%s4497_s0] sm:$0xff]  ;;  %3712 = vmatprep.mubr.bf16.mxu1 %v3992_v60  ;;  %v1085_v0 = vld [vmem:[%s4497_s0 + $0x8] sm:$0xff] }
 0x109   :  { %3696 = vmatprep.subr.bf16.mxu1 %v3984_v56  ;;  %1084 = vst [vmem:[#allocation2] sm:$0xff] %v1083_v61  ;;  %1086 = vst [vmem:[#allocation2 + $0x8] sm:$0xff] %v1085_v0  ;;  %v3994_v1 = vld [vmem:[#allocation2 + $0x10] sm:$0xff]   ;;  %v3995_v3 = vld [vmem:[#allocation2 + $0x18] sm:$0xff]  }
 0x10a   :  { %v3985_v57 = vld [vmem:[#allocation4 + $0x30] sm:$0xff]   ;;  %3697 = vmatpush3.bf16.msra.mxu1 %v3984_v56  ;;  %v1089_v4 = vld [vmem:[%s4497_s0 + $0x18] sm:$0xff]  ;;  %v3996_v6 = vld [vmem:[#allocation2 + $0x20] sm:$0xff]  }
 0x10b   :  { %3698 = vmatprep.subr.bf16.mxu1 %v3985_v57  ;;  %v1087_v2 = vld [vmem:[%s4497_s0 + $0x10] sm:$0xff]  ;;  %1090 = vst [vmem:[#allocation2 + $0x18] sm:$0xff] %v1089_v4  ;;  %v1091_v7 = vld [vmem:[%s4497_s0 + $0x20] sm:$0xff]  ;;  %v3997_v8 = vld [vmem:[#allocation2 + $0x28] sm:$0xff]  }
 0x10c   :  { %1088 = vst [vmem:[#allocation2 + $0x10] sm:$0xff] %v1087_v2  ;;  %v3989_v5 = vld [vmem:[#allocation4 + $0x10] sm:$0xff]   ;;  %1092 = vst [vmem:[#allocation2 + $0x20] sm:$0xff] %v1091_v7  ;;  %v1093_v9 = vld [vmem:[%s4497_s0 + $0x28] sm:$0xff] }
 0x10d   :  { %1094 = vst [vmem:[#allocation2 + $0x28] sm:$0xff] %v1093_v9  ;;  %v3998_v10 = vld [vmem:[#allocation2 + $0x30] sm:$0xff]   ;;  %v3990_v12 = vld [vmem:[#allocation4 + $0x8] sm:$0xff]   ;;  %v3999_v13 = vld [vmem:[#allocation2 + $0x38] sm:$0xff]  }
 0x10e   :  { %3699 = vmatpush3.bf16.msra.mxu1 %v3985_v57  ;;  %v1095_v11 = vld [vmem:[%s4497_s0 + $0x30] sm:$0xff]  ;;  %v1097_v14 = vld [vmem:[%s4497_s0 + $0x38] sm:$0xff]  ;;  %v3991_v17 = vld [vmem:[#allocation4] sm:$0xff]  }
 0x10f   :  { %3700 = vmatprep.subr.bf16.mxu1 %v3986_v58  ;;  %1096 = vst [vmem:[#allocation2 + $0x30] sm:$0xff] %v1095_v11  ;;  %1098 = vst [vmem:[#allocation2 + $0x38] sm:$0xff] %v1097_v14  ;;  %v4000_v15 = vld [vmem:[%s4493_s2 + $0x78] sm:$0xff]   ;;  %v4001_v16 = vld [vmem:[%s4493_s2 + $0x70] sm:$0xff]  }
 0x110   :  { %3728 = vmatprep.subr.bf16.mxu0 %v4000_v15  ;;  %v4002_v18 = vld [vmem:[%s4493_s2 + $0x68] sm:$0xff]   ;;  %v4003_v19 = vld [vmem:[%s4493_s2 + $0x60] sm:$0xff]   ;;  %v4004_v20 = vld [vmem:[%s4493_s2 + $0x58] sm:$0xff]  }
 0x111   :  { %3729 = vmatpush3.bf16.msra.mxu0 %v4000_v15  ;;  %v4005_v21 = vld [vmem:[%s4493_s2 + $0x50] sm:$0xff]   ;;  %v4006_v22 = vld [vmem:[%s4493_s2 + $0x48] sm:$0xff]   ;;  %v4007_v23 = vld [vmem:[%s4493_s2 + $0x40] sm:$0xff]  }
 0x112   :  { %3701 = vmatpush3.bf16.msra.mxu1 %v3986_v58  ;;  %3730 = vmatprep.subr.bf16.mxu0 %v4001_v16  ;;  %v4250_v25 = vld [vmem:[%s4494_s3] ss:$0 sm:$0xff] }
 0x113   :  { %3702 = vmatprep.subr.bf16.mxu1 %v3987_v59 }
 0x115   :  { %3731 = vmatpush3.bf16.msra.mxu0 %v4001_v16 }
 0x116   :  { %3703 = vmatpush3.bf16.msra.mxu1 %v3987_v59  ;;  %3732 = vmatprep.subr.bf16.mxu0 %v4002_v18 }
 0x117   :  { %3704 = vmatprep.subr.bf16.mxu1 %v3988_v62 }
 0x119   :  { %3733 = vmatpush3.bf16.msra.mxu0 %v4002_v18 }
 0x11a   :  { %3705 = vmatpush3.bf16.msra.mxu1 %v3988_v62  ;;  %3734 = vmatprep.subr.bf16.mxu0 %v4003_v19 }
 0x11b   :  { %3706 = vmatprep.subr.bf16.mxu1 %v3989_v5 }
 0x11d   :  { %3735 = vmatpush3.bf16.msra.mxu0 %v4003_v19 }
 0x11e   :  { %3707 = vmatpush3.bf16.msra.mxu1 %v3989_v5  ;;  %3736 = vmatprep.subr.bf16.mxu0 %v4004_v20 }
 0x11f   :  { %3708 = vmatprep.subr.bf16.mxu1 %v3990_v12 }
 0x121   :  { %3737 = vmatpush3.bf16.msra.mxu0 %v4004_v20 }
 0x122   :  { %3709 = vmatpush3.bf16.msra.mxu1 %v3990_v12  ;;  %3738 = vmatprep.subr.bf16.mxu0 %v4005_v21 }
 0x123   :  { %3710 = vmatprep.subr.bf16.mxu1 %v3991_v17 }
 0x125   :  { %3739 = vmatpush3.bf16.msra.mxu0 %v4005_v21 }
 0x126   :  { %3711 = vmatpush3.bf16.msra.mxu1 %v3991_v17  ;;  %3740 = vmatprep.subr.bf16.mxu0 %v4006_v22 }
 0x129   :  { %3713 = vmatmul.mubr.bf16.vlgmr.msra.gmra.mxu1 %v3993_v63  ;;  %3741 = vmatpush3.bf16.msra.mxu0 %v4006_v22 }
 0x12a   :  { %3716 = vmatprep.mubr.bf16.mxu1 %v3994_v1  ;;  %3742 = vmatprep.subr.bf16.mxu0 %v4007_v23 }
 0x12d   :  { %3743 = vmatpush3.bf16.msra.mxu0 %v4007_v23 }
 0x131   :  { %3717 = vmatmul.mubr.bf16.gmra.mxu1 %v3995_v3 }
 0x132   :  { %3720 = vmatprep.mubr.bf16.mxu1 %v3996_v6 }
 0x139   :  { %3721 = vmatmul.mubr.bf16.gmra.mxu1 %v3997_v8 }
 0x13a   :  { %3724 = vmatprep.mubr.bf16.mxu1 %v3998_v10 }
 0x141   :  { %3725 = vmatmul.mubr.bf16.gmra.mxu1 %v3999_v13 }
 0x1e9   :  { %v3714_v24 = vpop.f32.mrf.mxu1 }
 0x1ea   :  { %v592_v27 = vadd.f32 %v3714_v24, %v4250_v25 }
 0x1eb   :  { %v583_v26 = vpop.f32.mrf.mxu1 }
 0x1ec   :  { %v584_v29 = vadd.f32 %v4250_v25, %v583_v26  ;;  %v648_v32 = vmax.f32 %v592_v27, 0.0 }
 0x1ed   :  { %v3715_v28 = vpop.f32.mrf.mxu1 }
 0x1ee   :  { %v595_v30 = vadd.f32 %v3715_v28, %v4250_v25  ;;  %v646_v36 = vmax.f32 %v584_v29, 0.0 }
 0x1ef   :  { %v586_v31 = vpop.f32.mrf.mxu1 }
 0x1f0   :  { %v649_v33 = vmax.f32 %v595_v30, 0.0  ;;  %v587_v34 = vadd.f32 %v4250_v25, %v586_v31 }
 0x1f1   :  { %v3718_v35 = vpop.f32.mrf.mxu1 }
 0x1f2   :  { %v3286_v37 = vpack.c.bf16 %v649_v33, %v648_v32  ;;  %v647_v38 = vmax.f32 %v587_v34, 0.0  ;;  %v608_v41 = vadd.f32 %v3718_v35, %v4250_v25 }
 0x1f3   :  { %v599_v39 = vpop.f32.mrf.mxu1 }
 0x1f4   :  { %3485 = vst [vmem:[#allocation3 + $0x8] sm:$0xff] %v3286_v37   ;;  %v3281_v40 = vpack.c.bf16 %v647_v38, %v646_v36  ;;  %v600_v43 = vadd.f32 %v4250_v25, %v599_v39  ;;  %v652_v46 = vmax.f32 %v608_v41, 0.0 }
 0x1f5   :  { %v3719_v42 = vpop.f32.mrf.mxu1 }
 0x1f6   :  { %3282 = vst [vmem:[#allocation3] sm:$0xff] %v3281_v40   ;;  %v611_v44 = vadd.f32 %v3719_v42, %v4250_v25  ;;  %v650_v50 = vmax.f32 %v600_v43, 0.0 }
 0x1f7   :  { %v602_v45 = vpop.f32.mrf.mxu1 }
 0x1f8   :  { %v653_v47 = vmax.f32 %v611_v44, 0.0  ;;  %v603_v48 = vadd.f32 %v4250_v25, %v602_v45 }
 0x1f9   :  { %v3722_v49 = vpop.f32.mrf.mxu1 }
 0x1fa   :  { %v3296_v51 = vpack.c.bf16 %v653_v47, %v652_v46  ;;  %v651_v52 = vmax.f32 %v603_v48, 0.0  ;;  %v624_v55 = vadd.f32 %v3722_v49, %v4250_v25 }
 0x1fb   :  { %v615_v53 = vpop.f32.mrf.mxu1  ;;  %v4009_v60 = vld [vmem:[#allocation3 + $0x8] sm:$0xff]  }
 0x1fc   :  { %3487 = vst [vmem:[#allocation3 + $0x18] sm:$0xff] %v3296_v51   ;;  %v3291_v54 = vpack.c.bf16 %v651_v52, %v650_v50  ;;  %v616_v58 = vadd.f32 %v4250_v25, %v615_v53  ;;  %v656_v62 = vmax.f32 %v624_v55, 0.0 }
 0x1fd   :  { %v3723_v56 = vpop.f32.mrf.mxu1  ;;  %v4008_v57 = vld [vmem:[#allocation3] sm:$0xff]  }
 0x1fe   :  { %3486 = vst [vmem:[#allocation3 + $0x10] sm:$0xff] %v3291_v54   ;;  %v627_v59 = vadd.f32 %v3723_v56, %v4250_v25  ;;  %3744 = vmatprep.mubr.bf16.mxu0 %v4008_v57  ;;  %v654_v2 = vmax.f32 %v616_v58, 0.0 }
 0x1ff   :  { %v618_v61 = vpop.f32.mrf.mxu1  ;;  %3745 = vmatmul.mubr.bf16.vlgmr.msra.gmra.mxu0 %v4009_v60 }
 0x200   :  { %v657_v63 = vmax.f32 %v627_v59, 0.0  ;;  %v619_v0 = vadd.f32 %v4250_v25, %v618_v61 }
 0x201   :  { %v3726_v1 = vpop.f32.mrf.mxu1 }
 0x202   :  { %v3306_v3 = vpack.c.bf16 %v657_v63, %v656_v62  ;;  %v655_v4 = vmax.f32 %v619_v0, 0.0  ;;  %v640_v7 = vadd.f32 %v3726_v1, %v4250_v25 }
 0x203   :  { %v631_v5 = vpop.f32.mrf.mxu1  ;;  %v4011_v12 = vld [vmem:[#allocation3 + $0x18] sm:$0xff]  }
 0x204   :  { %3489 = vst [vmem:[#allocation3 + $0x28] sm:$0xff] %v3306_v3   ;;  %v3301_v6 = vpack.c.bf16 %v655_v4, %v654_v2  ;;  %v632_v10 = vadd.f32 %v4250_v25, %v631_v5  ;;  %v660_v14 = vmax.f32 %v640_v7, 0.0 }
 0x205   :  { %v3727_v8 = vpop.f32.mrf.mxu1  ;;  %v4010_v9 = vld [vmem:[#allocation3 + $0x10] sm:$0xff]  }
 0x206   :  { %3488 = vst [vmem:[#allocation3 + $0x20] sm:$0xff] %v3301_v6   ;;  %v643_v11 = vadd.f32 %v3727_v8, %v4250_v25  ;;  %3748 = vmatprep.mubr.bf16.mxu0 %v4010_v9  ;;  %v658_v17 = vmax.f32 %v632_v10, 0.0 }
 0x207   :  { %v634_v13 = vpop.f32.mrf.mxu1  ;;  %3749 = vmatmul.mubr.bf16.gmra.mxu0 %v4011_v12 }
 0x208   :  { %v661_v15 = vmax.f32 %v643_v11, 0.0  ;;  %v635_v16 = vadd.f32 %v4250_v25, %v634_v13 }
 0x20a   :  { %v3316_v18 = vpack.c.bf16 %v661_v15, %v660_v14  ;;  %v659_v19 = vmax.f32 %v635_v16, 0.0 }
 0x20b   :  { %v4013_v22 = vld [vmem:[#allocation3 + $0x28] sm:$0xff]  }
 0x20c   :  { %3491 = vst [vmem:[#allocation3 + $0x38] sm:$0xff] %v3316_v18   ;;  %v3311_v20 = vpack.c.bf16 %v659_v19, %v658_v17 }
 0x20d   :  { %v4012_v21 = vld [vmem:[#allocation3 + $0x20] sm:$0xff]  }
 0x20e   :  { %3490 = vst [vmem:[#allocation3 + $0x30] sm:$0xff] %v3311_v20   ;;  %3752 = vmatprep.mubr.bf16.mxu0 %v4012_v21 }
 0x20f   :  { %3753 = vmatmul.mubr.bf16.gmra.mxu0 %v4013_v22 }
 0x213   :  { %v4015_v24 = vld [vmem:[#allocation3 + $0x38] sm:$0xff]  }
 0x215   :  { %v4014_v23 = vld [vmem:[#allocation3 + $0x30] sm:$0xff]  }
 0x216   :  { %3756 = vmatprep.mubr.bf16.mxu0 %v4014_v23 }
 0x217   :  { %3757 = vmatmul.mubr.bf16.gmra.mxu0 %v4015_v24 }
 0x2bf   :  { %v3746_v26 = vpop.f32.mrf.mxu0 }
 0x2c1   :  { %v905_v27 = vpop.f32.mrf.mxu0 }
 0x2c3   :  { %v3747_v28 = vpop.f32.mrf.mxu0 }
 0x2c4   :  { %v3326_v29 = vpack.c.bf16 %v3747_v28, %v3746_v26 }
 0x2c5   :  { %v908_v25 = vpop.f32.mrf.mxu0 }
 0x2c6   :  { %3492 = vst [vmem:[#allocation4 + $0x8] sm:$0xff] %v3326_v29   ;;  %v3321_v30 = vpack.c.bf16 %v908_v25, %v905_v27 }
 0x2c7   :  { %v3750_v31 = vpop.f32.mrf.mxu0 }
 0x2c8   :  { %3322 = vst [vmem:[#allocation4] sm:$0xff] %v3321_v30  }
 0x2c9   :  { %v921_v32 = vpop.f32.mrf.mxu0 }
 0x2cb   :  { %v3751_v33 = vpop.f32.mrf.mxu0 }
 0x2cc   :  { %v3336_v34 = vpack.c.bf16 %v3751_v33, %v3750_v31 }
 0x2cd   :  { %v924_v35 = vpop.f32.mrf.mxu0 }
 0x2ce   :  { %3494 = vst [vmem:[#allocation4 + $0x18] sm:$0xff] %v3336_v34   ;;  %v3331_v36 = vpack.c.bf16 %v924_v35, %v921_v32 }
 0x2cf   :  { %v3754_v37 = vpop.f32.mrf.mxu0 }
 0x2d0   :  { %3493 = vst [vmem:[#allocation4 + $0x10] sm:$0xff] %v3331_v36  }
 0x2d1   :  { %v937_v38 = vpop.f32.mrf.mxu0 }
 0x2d3   :  { %v3755_v39 = vpop.f32.mrf.mxu0 }
 0x2d4   :  { %v3346_v40 = vpack.c.bf16 %v3755_v39, %v3754_v37 }
 0x2d5   :  { %v940_v41 = vpop.f32.mrf.mxu0 }
 0x2d6   :  { %3496 = vst [vmem:[#allocation4 + $0x28] sm:$0xff] %v3346_v40   ;;  %v3341_v42 = vpack.c.bf16 %v940_v41, %v937_v38 }
 0x2d7   :  { %v3758_v43 = vpop.f32.mrf.mxu0 }
 0x2d8   :  { %3495 = vst [vmem:[#allocation4 + $0x20] sm:$0xff] %v3341_v42  }
 0x2d9   :  { %v953_v44 = vpop.f32.mrf.mxu0 }
 0x2db   :  { %v3759_v45 = vpop.f32.mrf.mxu0 }
 0x2dc   :  { %v3356_v46 = vpack.c.bf16 %v3759_v45, %v3758_v43 }
 0x2dd   :  { %v956_v47 = vpop.f32.mrf.mxu0 }
 0x2de   :  { %3498 = vst [vmem:[#allocation4 + $0x38] sm:$0xff] %v3356_v46   ;;  %v3351_v48 = vpack.c.bf16 %v956_v47, %v953_v44 }
 0x2e0   :  { %3497 = vst [vmem:[#allocation4 + $0x30] sm:$0xff] %v3351_v48  }
 0x2e1   :  { %1106 = vsyncadd [#allocation5], 1024 }
 0x2e2   :  { %4098 = dma.done.wait [#allocation5], 1024 }
 0x2e3   :  { %4099 = vsyncadd [#allocation5], 4294966272  ;;  %v4018_v51 = vld [vmem:[#allocation4 + $0x28] sm:$0xff]   ;;  %v4019_v52 = vld [vmem:[#allocation4 + $0x20] sm:$0xff]  }
 0x2e4   :  { %v4024_v53 = vld [vmem:[#allocation2] sm:$0xff]   ;;  %v4020_v55 = vld [vmem:[#allocation4 + $0x18] sm:$0xff]   ;;  %v4025_v56 = vld [vmem:[#allocation2 + $0x8] sm:$0xff]  }
 0x2e5   :  { %v4016_v49 = vld [vmem:[#allocation4 + $0x38] sm:$0xff]   ;;  %v1777_v54 = vld [vmem:[%s4497_s0] sm:$0xff]  ;;  %3776 = vmatprep.mubr.bf16.mxu1 %v4024_v53  ;;  %v1779_v57 = vld [vmem:[%s4497_s0 + $0x8] sm:$0xff] }
 0x2e6   :  { %3760 = vmatprep.subr.bf16.mxu1 %v4016_v49  ;;  %1778 = vst [vmem:[#allocation2] sm:$0xff] %v1777_v54  ;;  %1780 = vst [vmem:[#allocation2 + $0x8] sm:$0xff] %v1779_v57  ;;  %v4026_v58 = vld [vmem:[#allocation2 + $0x10] sm:$0xff]   ;;  %v4027_v60 = vld [vmem:[#allocation2 + $0x18] sm:$0xff]  }
 0x2e7   :  { %v4017_v50 = vld [vmem:[#allocation4 + $0x30] sm:$0xff]   ;;  %3761 = vmatpush3.bf16.msra.mxu1 %v4016_v49  ;;  %v1783_v61 = vld [vmem:[%s4497_s0 + $0x18] sm:$0xff]  ;;  %v4028_v63 = vld [vmem:[#allocation2 + $0x20] sm:$0xff]  }
 0x2e8   :  { %3762 = vmatprep.subr.bf16.mxu1 %v4017_v50  ;;  %v1781_v59 = vld [vmem:[%s4497_s0 + $0x10] sm:$0xff]  ;;  %1784 = vst [vmem:[#allocation2 + $0x18] sm:$0xff] %v1783_v61  ;;  %v1785_v0 = vld [vmem:[%s4497_s0 + $0x20] sm:$0xff]  ;;  %v4029_v1 = vld [vmem:[#allocation2 + $0x28] sm:$0xff]  }
 0x2e9   :  { %1782 = vst [vmem:[#allocation2 + $0x10] sm:$0xff] %v1781_v59  ;;  %v4021_v62 = vld [vmem:[#allocation4 + $0x10] sm:$0xff]   ;;  %1786 = vst [vmem:[#allocation2 + $0x20] sm:$0xff] %v1785_v0  ;;  %v1787_v2 = vld [vmem:[%s4497_s0 + $0x28] sm:$0xff] }
 0x2ea   :  { %1788 = vst [vmem:[#allocation2 + $0x28] sm:$0xff] %v1787_v2  ;;  %v4030_v3 = vld [vmem:[#allocation2 + $0x30] sm:$0xff]   ;;  %v4022_v5 = vld [vmem:[#allocation4 + $0x8] sm:$0xff]   ;;  %v4031_v6 = vld [vmem:[#allocation2 + $0x38] sm:$0xff]  }
 0x2eb   :  { %3763 = vmatpush3.bf16.msra.mxu1 %v4017_v50  ;;  %v1789_v4 = vld [vmem:[%s4497_s0 + $0x30] sm:$0xff]  ;;  %v1791_v7 = vld [vmem:[%s4497_s0 + $0x38] sm:$0xff]  ;;  %v4023_v10 = vld [vmem:[#allocation4] sm:$0xff]  }
 0x2ec   :  { %3764 = vmatprep.subr.bf16.mxu1 %v4018_v51  ;;  %1790 = vst [vmem:[#allocation2 + $0x30] sm:$0xff] %v1789_v4  ;;  %1792 = vst [vmem:[#allocation2 + $0x38] sm:$0xff] %v1791_v7  ;;  %v4032_v8 = vld [vmem:[%s4493_s2 + $0xb8] sm:$0xff]   ;;  %v4033_v9 = vld [vmem:[%s4493_s2 + $0xb0] sm:$0xff]  }
 0x2ed   :  { %3792 = vmatprep.subr.bf16.mxu0 %v4032_v8  ;;  %v4034_v11 = vld [vmem:[%s4493_s2 + $0xa8] sm:$0xff]   ;;  %v4035_v12 = vld [vmem:[%s4493_s2 + $0xa0] sm:$0xff]   ;;  %v4036_v13 = vld [vmem:[%s4493_s2 + $0x98] sm:$0xff]  }
 0x2ee   :  { %3793 = vmatpush3.bf16.msra.mxu0 %v4032_v8  ;;  %v4037_v14 = vld [vmem:[%s4493_s2 + $0x90] sm:$0xff]   ;;  %v4038_v15 = vld [vmem:[%s4493_s2 + $0x88] sm:$0xff]   ;;  %v4039_v16 = vld [vmem:[%s4493_s2 + $0x80] sm:$0xff]  }
 0x2ef   :  { %3765 = vmatpush3.bf16.msra.mxu1 %v4018_v51  ;;  %3794 = vmatprep.subr.bf16.mxu0 %v4033_v9  ;;  %v4319_v18 = vld [vmem:[%s4494_s3 + $0x1] ss:$0 sm:$0xff] }
 0x2f0   :  { %3766 = vmatprep.subr.bf16.mxu1 %v4019_v52 }
 0x2f2   :  { %3795 = vmatpush3.bf16.msra.mxu0 %v4033_v9 }
 0x2f3   :  { %3767 = vmatpush3.bf16.msra.mxu1 %v4019_v52  ;;  %3796 = vmatprep.subr.bf16.mxu0 %v4034_v11 }
 0x2f4   :  { %3768 = vmatprep.subr.bf16.mxu1 %v4020_v55 }
 0x2f6   :  { %3797 = vmatpush3.bf16.msra.mxu0 %v4034_v11 }
 0x2f7   :  { %3769 = vmatpush3.bf16.msra.mxu1 %v4020_v55  ;;  %3798 = vmatprep.subr.bf16.mxu0 %v4035_v12 }
 0x2f8   :  { %3770 = vmatprep.subr.bf16.mxu1 %v4021_v62 }
 0x2fa   :  { %3799 = vmatpush3.bf16.msra.mxu0 %v4035_v12 }
 0x2fb   :  { %3771 = vmatpush3.bf16.msra.mxu1 %v4021_v62  ;;  %3800 = vmatprep.subr.bf16.mxu0 %v4036_v13 }
 0x2fc   :  { %3772 = vmatprep.subr.bf16.mxu1 %v4022_v5 }
 0x2fe   :  { %3801 = vmatpush3.bf16.msra.mxu0 %v4036_v13 }
 0x2ff   :  { %3773 = vmatpush3.bf16.msra.mxu1 %v4022_v5  ;;  %3802 = vmatprep.subr.bf16.mxu0 %v4037_v14 }
 0x300   :  { %3774 = vmatprep.subr.bf16.mxu1 %v4023_v10 }
 0x302   :  { %3803 = vmatpush3.bf16.msra.mxu0 %v4037_v14 }
 0x303   :  { %3775 = vmatpush3.bf16.msra.mxu1 %v4023_v10  ;;  %3804 = vmatprep.subr.bf16.mxu0 %v4038_v15 }
 0x306   :  { %3777 = vmatmul.mubr.bf16.vlgmr.msra.gmra.mxu1 %v4025_v56  ;;  %3805 = vmatpush3.bf16.msra.mxu0 %v4038_v15 }
 0x307   :  { %3780 = vmatprep.mubr.bf16.mxu1 %v4026_v58  ;;  %3806 = vmatprep.subr.bf16.mxu0 %v4039_v16 }
 0x30a   :  { %3807 = vmatpush3.bf16.msra.mxu0 %v4039_v16 }
 0x30e   :  { %3781 = vmatmul.mubr.bf16.gmra.mxu1 %v4027_v60 }
 0x30f   :  { %3784 = vmatprep.mubr.bf16.mxu1 %v4028_v63 }
 0x316   :  { %3785 = vmatmul.mubr.bf16.gmra.mxu1 %v4029_v1 }
 0x317   :  { %3788 = vmatprep.mubr.bf16.mxu1 %v4030_v3 }
 0x31e   :  { %3789 = vmatmul.mubr.bf16.gmra.mxu1 %v4031_v6 }
 0x3c6   :  { %v3778_v17 = vpop.f32.mrf.mxu1 }
 0x3c7   :  { %v1286_v20 = vadd.f32 %v3778_v17, %v4319_v18 }
 0x3c8   :  { %v1277_v19 = vpop.f32.mrf.mxu1 }
 0x3c9   :  { %v1278_v22 = vadd.f32 %v4319_v18, %v1277_v19  ;;  %v1342_v26 = vmax.f32 %v1286_v20, 0.0 }
 0x3ca   :  { %v3779_v21 = vpop.f32.mrf.mxu1 }
 0x3cb   :  { %v1289_v23 = vadd.f32 %v3779_v21, %v4319_v18  ;;  %v1340_v25 = vmax.f32 %v1278_v22, 0.0 }
 0x3cc   :  { %v1280_v24 = vpop.f32.mrf.mxu1 }
 0x3cd   :  { %v1343_v27 = vmax.f32 %v1289_v23, 0.0  ;;  %v1281_v28 = vadd.f32 %v4319_v18, %v1280_v24 }
 0x3ce   :  { %v3782_v29 = vpop.f32.mrf.mxu1 }
 0x3cf   :  { %v3366_v30 = vpack.c.bf16 %v1343_v27, %v1342_v26  ;;  %v1341_v31 = vmax.f32 %v1281_v28, 0.0  ;;  %v1302_v34 = vadd.f32 %v3782_v29, %v4319_v18 }
 0x3d0   :  { %v1293_v32 = vpop.f32.mrf.mxu1 }
 0x3d1   :  { %3499 = vst [vmem:[#allocation3 + $0x8] sm:$0xff] %v3366_v30   ;;  %v3361_v33 = vpack.c.bf16 %v1341_v31, %v1340_v25  ;;  %v1294_v36 = vadd.f32 %v4319_v18, %v1293_v32  ;;  %v1346_v39 = vmax.f32 %v1302_v34, 0.0 }
 0x3d2   :  { %v3783_v35 = vpop.f32.mrf.mxu1 }
 0x3d3   :  { %3362 = vst [vmem:[#allocation3] sm:$0xff] %v3361_v33   ;;  %v1305_v37 = vadd.f32 %v3783_v35, %v4319_v18  ;;  %v1344_v43 = vmax.f32 %v1294_v36, 0.0 }
 0x3d4   :  { %v1296_v38 = vpop.f32.mrf.mxu1 }
 0x3d5   :  { %v1347_v40 = vmax.f32 %v1305_v37, 0.0  ;;  %v1297_v41 = vadd.f32 %v4319_v18, %v1296_v38 }
 0x3d6   :  { %v3786_v42 = vpop.f32.mrf.mxu1 }
 0x3d7   :  { %v3376_v44 = vpack.c.bf16 %v1347_v40, %v1346_v39  ;;  %v1345_v45 = vmax.f32 %v1297_v41, 0.0  ;;  %v1318_v48 = vadd.f32 %v3786_v42, %v4319_v18 }
 0x3d8   :  { %v1309_v46 = vpop.f32.mrf.mxu1  ;;  %v4041_v53 = vld [vmem:[#allocation3 + $0x8] sm:$0xff]  }
 0x3d9   :  { %3501 = vst [vmem:[#allocation3 + $0x18] sm:$0xff] %v3376_v44   ;;  %v3371_v47 = vpack.c.bf16 %v1345_v45, %v1344_v43  ;;  %v1310_v51 = vadd.f32 %v4319_v18, %v1309_v46  ;;  %v1350_v55 = vmax.f32 %v1318_v48, 0.0 }
 0x3da   :  { %v3787_v49 = vpop.f32.mrf.mxu1  ;;  %v4040_v50 = vld [vmem:[#allocation3] sm:$0xff]  }
 0x3db   :  { %3500 = vst [vmem:[#allocation3 + $0x10] sm:$0xff] %v3371_v47   ;;  %v1321_v52 = vadd.f32 %v3787_v49, %v4319_v18  ;;  %3808 = vmatprep.mubr.bf16.mxu0 %v4040_v50  ;;  %v1348_v59 = vmax.f32 %v1310_v51, 0.0 }
 0x3dc   :  { %v1312_v54 = vpop.f32.mrf.mxu1  ;;  %3809 = vmatmul.mubr.bf16.vlgmr.msra.gmra.mxu0 %v4041_v53 }
 0x3dd   :  { %v1351_v56 = vmax.f32 %v1321_v52, 0.0  ;;  %v1313_v57 = vadd.f32 %v4319_v18, %v1312_v54 }
 0x3de   :  { %v3790_v58 = vpop.f32.mrf.mxu1 }
 0x3df   :  { %v3386_v60 = vpack.c.bf16 %v1351_v56, %v1350_v55  ;;  %v1349_v61 = vmax.f32 %v1313_v57, 0.0  ;;  %v1334_v0 = vadd.f32 %v3790_v58, %v4319_v18 }
 0x3e0   :  { %v1325_v62 = vpop.f32.mrf.mxu1  ;;  %v4043_v5 = vld [vmem:[#allocation3 + $0x18] sm:$0xff]  }
 0x3e1   :  { %3503 = vst [vmem:[#allocation3 + $0x28] sm:$0xff] %v3386_v60   ;;  %v3381_v63 = vpack.c.bf16 %v1349_v61, %v1348_v59  ;;  %v1326_v3 = vadd.f32 %v4319_v18, %v1325_v62  ;;  %v1354_v7 = vmax.f32 %v1334_v0, 0.0 }
 0x3e2   :  { %v3791_v1 = vpop.f32.mrf.mxu1  ;;  %v4042_v2 = vld [vmem:[#allocation3 + $0x10] sm:$0xff]  }
 0x3e3   :  { %3502 = vst [vmem:[#allocation3 + $0x20] sm:$0xff] %v3381_v63   ;;  %v1337_v4 = vadd.f32 %v3791_v1, %v4319_v18  ;;  %3812 = vmatprep.mubr.bf16.mxu0 %v4042_v2  ;;  %v1352_v10 = vmax.f32 %v1326_v3, 0.0 }
 0x3e4   :  { %v1328_v6 = vpop.f32.mrf.mxu1  ;;  %3813 = vmatmul.mubr.bf16.gmra.mxu0 %v4043_v5 }
 0x3e5   :  { %v1355_v8 = vmax.f32 %v1337_v4, 0.0  ;;  %v1329_v9 = vadd.f32 %v4319_v18, %v1328_v6 }
 0x3e7   :  { %v3396_v11 = vpack.c.bf16 %v1355_v8, %v1354_v7  ;;  %v1353_v12 = vmax.f32 %v1329_v9, 0.0 }
 0x3e8   :  { %v4045_v15 = vld [vmem:[#allocation3 + $0x28] sm:$0xff]  }
 0x3e9   :  { %3505 = vst [vmem:[#allocation3 + $0x38] sm:$0xff] %v3396_v11   ;;  %v3391_v13 = vpack.c.bf16 %v1353_v12, %v1352_v10 }
 0x3ea   :  { %v4044_v14 = vld [vmem:[#allocation3 + $0x20] sm:$0xff]  }
 0x3eb   :  { %3504 = vst [vmem:[#allocation3 + $0x30] sm:$0xff] %v3391_v13   ;;  %3816 = vmatprep.mubr.bf16.mxu0 %v4044_v14 }
 0x3ec   :  { %3817 = vmatmul.mubr.bf16.gmra.mxu0 %v4045_v15 }
 0x3f0   :  { %v4047_v17 = vld [vmem:[#allocation3 + $0x38] sm:$0xff]  }
 0x3f2   :  { %v4046_v16 = vld [vmem:[#allocation3 + $0x30] sm:$0xff]  }
 0x3f3   :  { %3820 = vmatprep.mubr.bf16.mxu0 %v4046_v16 }
 0x3f4   :  { %3821 = vmatmul.mubr.bf16.gmra.mxu0 %v4047_v17 }
 0x49c   :  { %v3810_v19 = vpop.f32.mrf.mxu0 }
 0x49e   :  { %v1599_v20 = vpop.f32.mrf.mxu0 }
 0x4a0   :  { %v3811_v21 = vpop.f32.mrf.mxu0 }
 0x4a1   :  { %v3406_v22 = vpack.c.bf16 %v3811_v21, %v3810_v19 }
 0x4a2   :  { %v1602_v18 = vpop.f32.mrf.mxu0 }
 0x4a3   :  { %3506 = vst [vmem:[#allocation4 + $0x8] sm:$0xff] %v3406_v22   ;;  %v3401_v23 = vpack.c.bf16 %v1602_v18, %v1599_v20 }
 0x4a4   :  { %v3814_v24 = vpop.f32.mrf.mxu0 }
 0x4a5   :  { %3402 = vst [vmem:[#allocation4] sm:$0xff] %v3401_v23  }
 0x4a6   :  { %v1615_v26 = vpop.f32.mrf.mxu0 }
 0x4a8   :  { %v3815_v27 = vpop.f32.mrf.mxu0 }
 0x4a9   :  { %v3416_v28 = vpack.c.bf16 %v3815_v27, %v3814_v24 }
 0x4aa   :  { %v1618_v29 = vpop.f32.mrf.mxu0 }
 0x4ab   :  { %3508 = vst [vmem:[#allocation4 + $0x18] sm:$0xff] %v3416_v28   ;;  %v3411_v25 = vpack.c.bf16 %v1618_v29, %v1615_v26 }
 0x4ac   :  { %v3818_v30 = vpop.f32.mrf.mxu0 }
 0x4ad   :  { %3507 = vst [vmem:[#allocation4 + $0x10] sm:$0xff] %v3411_v25  }
 0x4ae   :  { %v1631_v31 = vpop.f32.mrf.mxu0 }
 0x4b0   :  { %v3819_v32 = vpop.f32.mrf.mxu0 }
 0x4b1   :  { %v3426_v33 = vpack.c.bf16 %v3819_v32, %v3818_v30 }
 0x4b2   :  { %v1634_v34 = vpop.f32.mrf.mxu0 }
 0x4b3   :  { %3510 = vst [vmem:[#allocation4 + $0x28] sm:$0xff] %v3426_v33   ;;  %v3421_v35 = vpack.c.bf16 %v1634_v34, %v1631_v31 }
 0x4b4   :  { %v3822_v36 = vpop.f32.mrf.mxu0 }
 0x4b5   :  { %3509 = vst [vmem:[#allocation4 + $0x20] sm:$0xff] %v3421_v35  }
 0x4b6   :  { %v1647_v37 = vpop.f32.mrf.mxu0 }
 0x4b8   :  { %v3823_v38 = vpop.f32.mrf.mxu0 }
 0x4b9   :  { %v3436_v39 = vpack.c.bf16 %v3823_v38, %v3822_v36 }
 0x4ba   :  { %v1650_v40 = vpop.f32.mrf.mxu0 }
 0x4bb   :  { %3512 = vst [vmem:[#allocation4 + $0x38] sm:$0xff] %v3436_v39   ;;  %v3431_v41 = vpack.c.bf16 %v1650_v40, %v1647_v37 }
 0x4bd   :  { %3511 = vst [vmem:[#allocation4 + $0x30] sm:$0xff] %v3431_v41  }
 0x4be   :  { %1800 = vsyncadd [#allocation5], 1024 }
 0x4bf   :  { %4100 = dma.done.wait [#allocation5], 1024 }
 0x4c0   :  { %4101 = vsyncadd [#allocation5], 4294966272  ;;  %v4050_v44 = vld [vmem:[#allocation4 + $0x28] sm:$0xff]   ;;  %v4051_v45 = vld [vmem:[#allocation4 + $0x20] sm:$0xff]  }
 0x4c1   :  { %v4056_v46 = vld [vmem:[#allocation2] sm:$0xff]   ;;  %v4052_v47 = vld [vmem:[#allocation4 + $0x18] sm:$0xff]   ;;  %v4053_v48 = vld [vmem:[#allocation4 + $0x10] sm:$0xff]  }
 0x4c2   :  { %v4048_v42 = vld [vmem:[#allocation4 + $0x38] sm:$0xff]   ;;  %3840 = vmatprep.mubr.bf16.mxu1 %v4056_v46  ;;  %v4065_v50 = vld [vmem:[%s4493_s2 + $0xf0] sm:$0xff]   ;;  %v4054_v51 = vld [vmem:[#allocation4 + $0x8] sm:$0xff]  }
 0x4c3   :  { %3824 = vmatprep.subr.bf16.mxu1 %v4048_v42  ;;  %v4064_v49 = vld [vmem:[%s4493_s2 + $0xf8] sm:$0xff]   ;;  %v4055_v52 = vld [vmem:[#allocation4] sm:$0xff]   ;;  %v4057_v53 = vld [vmem:[#allocation2 + $0x8] sm:$0xff]  }
 0x4c4   :  { %v4049_v43 = vld [vmem:[#allocation4 + $0x30] sm:$0xff]   ;;  %3825 = vmatpush3.bf16.msra.mxu1 %v4048_v42  ;;  %3856 = vmatprep.subr.bf16.mxu0 %v4064_v49  ;;  %v4059_v55 = vld [vmem:[#allocation2 + $0x18] sm:$0xff]   ;;  %v4060_v56 = vld [vmem:[#allocation2 + $0x20] sm:$0xff]  }
 0x4c5   :  { %3826 = vmatprep.subr.bf16.mxu1 %v4049_v43  ;;  %3857 = vmatpush3.bf16.msra.mxu0 %v4064_v49  ;;  %v4058_v54 = vld [vmem:[#allocation2 + $0x10] sm:$0xff]   ;;  %v4061_v57 = vld [vmem:[#allocation2 + $0x28] sm:$0xff]   ;;  %v4063_v59 = vld [vmem:[#allocation2 + $0x38] sm:$0xff]  }
 0x4c6   :  { %3858 = vmatprep.subr.bf16.mxu0 %v4065_v50  ;;  %v4062_v58 = vld [vmem:[#allocation2 + $0x30] sm:$0xff]   ;;  %v4066_v60 = vld [vmem:[%s4493_s2 + $0xe8] sm:$0xff]   ;;  %v4067_v61 = vld [vmem:[%s4493_s2 + $0xe0] sm:$0xff]  }
 0x4c7   :  { %v4068_v62 = vld [vmem:[%s4493_s2 + $0xd8] sm:$0xff]   ;;  %v4069_v63 = vld [vmem:[%s4493_s2 + $0xd0] sm:$0xff]   ;;  %v4070_v0 = vld [vmem:[%s4493_s2 + $0xc8] sm:$0xff]  }
 0x4c8   :  { %3827 = vmatpush3.bf16.msra.mxu1 %v4049_v43  ;;  %v4071_v1 = vld [vmem:[%s4493_s2 + $0xc0] sm:$0xff]   ;;  %v4080_v2 = vld [vmem:[%s4493_s2 + $0x138] sm:$0xff]   ;;  %v4081_v3 = vld [vmem:[%s4493_s2 + $0x130] sm:$0xff]  }
 0x4c9   :  { %3828 = vmatprep.subr.bf16.mxu1 %v4050_v44  ;;  %3859 = vmatpush3.bf16.msra.mxu0 %v4065_v50  ;;  %v4082_v4 = vld [vmem:[%s4493_s2 + $0x128] sm:$0xff]   ;;  %v4083_v5 = vld [vmem:[%s4493_s2 + $0x120] sm:$0xff]   ;;  %v4084_v6 = vld [vmem:[%s4493_s2 + $0x118] sm:$0xff]  }
 0x4ca   :  { %3860 = vmatprep.subr.bf16.mxu0 %v4066_v60  ;;  %v4379_v8 = vld [vmem:[%s4494_s3 + $0x2] ss:$0 sm:$0xff] }
 0x4cc   :  { %3829 = vmatpush3.bf16.msra.mxu1 %v4050_v44 }
 0x4cd   :  { %3830 = vmatprep.subr.bf16.mxu1 %v4051_v45  ;;  %3861 = vmatpush3.bf16.msra.mxu0 %v4066_v60 }
 0x4ce   :  { %3862 = vmatprep.subr.bf16.mxu0 %v4067_v61 }
 0x4d0   :  { %3831 = vmatpush3.bf16.msra.mxu1 %v4051_v45 }
 0x4d1   :  { %3832 = vmatprep.subr.bf16.mxu1 %v4052_v47  ;;  %3863 = vmatpush3.bf16.msra.mxu0 %v4067_v61 }
 0x4d2   :  { %3864 = vmatprep.subr.bf16.mxu0 %v4068_v62 }
 0x4d4   :  { %3833 = vmatpush3.bf16.msra.mxu1 %v4052_v47 }
 0x4d5   :  { %3834 = vmatprep.subr.bf16.mxu1 %v4053_v48  ;;  %3865 = vmatpush3.bf16.msra.mxu0 %v4068_v62 }
 0x4d6   :  { %3866 = vmatprep.subr.bf16.mxu0 %v4069_v63 }
 0x4d8   :  { %3835 = vmatpush3.bf16.msra.mxu1 %v4053_v48 }
 0x4d9   :  { %3836 = vmatprep.subr.bf16.mxu1 %v4054_v51  ;;  %3867 = vmatpush3.bf16.msra.mxu0 %v4069_v63 }
 0x4da   :  { %3868 = vmatprep.subr.bf16.mxu0 %v4070_v0 }
 0x4dc   :  { %3837 = vmatpush3.bf16.msra.mxu1 %v4054_v51 }
 0x4dd   :  { %3838 = vmatprep.subr.bf16.mxu1 %v4055_v52  ;;  %3869 = vmatpush3.bf16.msra.mxu0 %v4070_v0 }
 0x4de   :  { %3870 = vmatprep.subr.bf16.mxu0 %v4071_v1 }
 0x4e0   :  { %3839 = vmatpush3.bf16.msra.mxu1 %v4055_v52 }
 0x4e1   :  { %3871 = vmatpush3.bf16.msra.mxu0 %v4071_v1  ;;  %3888 = vmatprep.subr.bf16.mxu1 %v4080_v2 }
 0x4e3   :  { %3841 = vmatmul.mubr.bf16.vlgmr.msra.gmra.mxu1 %v4057_v53 }
 0x4e4   :  { %3844 = vmatprep.mubr.bf16.mxu1 %v4058_v54  ;;  %3889 = vmatpush3.bf16.msra.mxu1 %v4080_v2 }
 0x4e5   :  { %3890 = vmatprep.subr.bf16.mxu1 %v4081_v3 }
 0x4e8   :  { %3891 = vmatpush3.bf16.msra.mxu1 %v4081_v3 }
 0x4e9   :  { %3892 = vmatprep.subr.bf16.mxu1 %v4082_v4 }
 0x4eb   :  { %3845 = vmatmul.mubr.bf16.gmra.mxu1 %v4059_v55 }
 0x4ec   :  { %3848 = vmatprep.mubr.bf16.mxu1 %v4060_v56  ;;  %3893 = vmatpush3.bf16.msra.mxu1 %v4082_v4 }
 0x4ed   :  { %3894 = vmatprep.subr.bf16.mxu1 %v4083_v5 }
 0x4f0   :  { %3895 = vmatpush3.bf16.msra.mxu1 %v4083_v5 }
 0x4f1   :  { %3896 = vmatprep.subr.bf16.mxu1 %v4084_v6 }
 0x4f3   :  { %3849 = vmatmul.mubr.bf16.gmra.mxu1 %v4061_v57 }
 0x4f4   :  { %3852 = vmatprep.mubr.bf16.mxu1 %v4062_v58  ;;  %3897 = vmatpush3.bf16.msra.mxu1 %v4084_v6 }
 0x4fb   :  { %3853 = vmatmul.mubr.bf16.gmra.mxu1 %v4063_v59 }
 0x5a3   :  { %v3842_v7 = vpop.f32.mrf.mxu1 }
 0x5a4   :  { %v1980_v10 = vadd.f32 %v3842_v7, %v4379_v8 }
 0x5a5   :  { %v1971_v9 = vpop.f32.mrf.mxu1 }
 0x5a6   :  { %v1972_v12 = vadd.f32 %v4379_v8, %v1971_v9  ;;  %v2036_v15 = vmax.f32 %v1980_v10, 0.0  ;;  %v4085_v9 = vld [vmem:[%s4493_s2 + $0x110] sm:$0xff]   ;;  %v4087_v10 = vld [vmem:[%s4493_s2 + $0x100] sm:$0xff]  }
 0x5a7   :  { %v3843_v11 = vpop.f32.mrf.mxu1  ;;  %3898 = vmatprep.subr.bf16.mxu1 %v4085_v9 }
 0x5a8   :  { %v1983_v13 = vadd.f32 %v3843_v11, %v4379_v8  ;;  %v2034_v20 = vmax.f32 %v1972_v12, 0.0  ;;  %3899 = vmatpush3.bf16.msra.mxu1 %v4085_v9  ;;  %v4088_v11 = vld [vmem:[%s4493_s2 + $0x178] sm:$0xff]   ;;  %v4089_v12 = vld [vmem:[%s4493_s2 + $0x170] sm:$0xff]  }
 0x5a9   :  { %v1974_v14 = vpop.f32.mrf.mxu1  ;;  %3920 = vmatprep.subr.bf16.mxu0 %v4088_v11 }
 0x5aa   :  { %v2037_v16 = vmax.f32 %v1983_v13, 0.0  ;;  %v1975_v17 = vadd.f32 %v4379_v8, %v1974_v14  ;;  %v4090_v13 = vld [vmem:[%s4493_s2 + $0x168] sm:$0xff]   ;;  %v4091_v14 = vld [vmem:[%s4493_s2 + $0x160] sm:$0xff]  }
 0x5ab   :  { %v3846_v19 = vpop.f32.mrf.mxu1 }
 0x5ac   :  { %v3446_v21 = vpack.c.bf16 %v2037_v16, %v2036_v15  ;;  %v2035_v22 = vmax.f32 %v1975_v17, 0.0  ;;  %v1996_v24 = vadd.f32 %v3846_v19, %v4379_v8  ;;  %v4421_v15 = vld [vmem:[%s4493_s2 + $0x158] sm:$0xff]   ;;  %v3071_v19 = vld [vmem:[%s4494_s3 + $0x3] ss:$0 sm:$0xff] }
 0x5ad   :  { %v1987_v18 = vpop.f32.mrf.mxu1 }
 0x5ae   :  { %3513 = vst [vmem:[#allocation3 + $0x8] sm:$0xff] %v3446_v21   ;;  %v3441_v23 = vpack.c.bf16 %v2035_v22, %v2034_v20  ;;  %v1988_v27 = vadd.f32 %v4379_v8, %v1987_v18  ;;  %v2040_v25 = vmax.f32 %v1996_v24, 0.0 }
 0x5af   :  { %v3847_v26 = vpop.f32.mrf.mxu1 }
 0x5b0   :  { %3442 = vst [vmem:[#allocation3] sm:$0xff] %v3441_v23   ;;  %v1999_v28 = vadd.f32 %v3847_v26, %v4379_v8  ;;  %v2038_v33 = vmax.f32 %v1988_v27, 0.0 }
 0x5b1   :  { %v1990_v29 = vpop.f32.mrf.mxu1 }
 0x5b2   :  { %v2041_v30 = vmax.f32 %v1999_v28, 0.0  ;;  %v1991_v31 = vadd.f32 %v4379_v8, %v1990_v29 }
 0x5b3   :  { %v3850_v32 = vpop.f32.mrf.mxu1 }
 0x5b4   :  { %v3456_v34 = vpack.c.bf16 %v2041_v30, %v2040_v25  ;;  %v2039_v35 = vmax.f32 %v1991_v31, 0.0  ;;  %v2012_v38 = vadd.f32 %v3850_v32, %v4379_v8 }
 0x5b5   :  { %v2003_v36 = vpop.f32.mrf.mxu1  ;;  %v4073_v43 = vld [vmem:[#allocation3 + $0x8] sm:$0xff]  }
 0x5b6   :  { %3515 = vst [vmem:[#allocation3 + $0x18] sm:$0xff] %v3456_v34   ;;  %v3451_v37 = vpack.c.bf16 %v2039_v35, %v2038_v33  ;;  %v2004_v41 = vadd.f32 %v4379_v8, %v2003_v36  ;;  %v2044_v45 = vmax.f32 %v2012_v38, 0.0 }
 0x5b7   :  { %v3851_v39 = vpop.f32.mrf.mxu1  ;;  %v4072_v40 = vld [vmem:[#allocation3] sm:$0xff]  }
 0x5b8   :  { %3514 = vst [vmem:[#allocation3 + $0x10] sm:$0xff] %v3451_v37   ;;  %v2015_v42 = vadd.f32 %v3851_v39, %v4379_v8  ;;  %3872 = vmatprep.mubr.bf16.mxu0 %v4072_v40  ;;  %v2042_v49 = vmax.f32 %v2004_v41, 0.0 }
 0x5b9   :  { %v2006_v44 = vpop.f32.mrf.mxu1  ;;  %3873 = vmatmul.mubr.bf16.vlgmr.msra.gmra.mxu0 %v4073_v43 }
 0x5ba   :  { %v2045_v46 = vmax.f32 %v2015_v42, 0.0  ;;  %v2007_v47 = vadd.f32 %v4379_v8, %v2006_v44  ;;  %3921 = vmatpush3.bf16.msra.mxu0 %v4088_v11 }
 0x5bb   :  { %v3854_v48 = vpop.f32.mrf.mxu1  ;;  %3922 = vmatprep.subr.bf16.mxu0 %v4089_v12 }
 0x5bc   :  { %v3466_v50 = vpack.c.bf16 %v2045_v46, %v2044_v45  ;;  %v2043_v51 = vmax.f32 %v2007_v47, 0.0  ;;  %v2028_v54 = vadd.f32 %v3854_v48, %v4379_v8 }
 0x5bd   :  { %v2019_v52 = vpop.f32.mrf.mxu1  ;;  %v4075_v59 = vld [vmem:[#allocation3 + $0x18] sm:$0xff]  }
 0x5be   :  { %3517 = vst [vmem:[#allocation3 + $0x28] sm:$0xff] %v3466_v50   ;;  %v3461_v53 = vpack.c.bf16 %v2043_v51, %v2042_v49  ;;  %v2020_v57 = vadd.f32 %v4379_v8, %v2019_v52  ;;  %v2048_v61 = vmax.f32 %v2028_v54, 0.0  ;;  %3923 = vmatpush3.bf16.msra.mxu0 %v4089_v12 }
 0x5bf   :  { %v3855_v55 = vpop.f32.mrf.mxu1  ;;  %v4074_v56 = vld [vmem:[#allocation3 + $0x10] sm:$0xff]   ;;  %3924 = vmatprep.subr.bf16.mxu0 %v4090_v13 }
 0x5c0   :  { %3516 = vst [vmem:[#allocation3 + $0x20] sm:$0xff] %v3461_v53   ;;  %v2031_v58 = vadd.f32 %v3855_v55, %v4379_v8  ;;  %3876 = vmatprep.mubr.bf16.mxu0 %v4074_v56  ;;  %v2046_v0 = vmax.f32 %v2020_v57, 0.0 }
 0x5c1   :  { %v2022_v60 = vpop.f32.mrf.mxu1  ;;  %3877 = vmatmul.mubr.bf16.gmra.mxu0 %v4075_v59 }
 0x5c2   :  { %v2049_v62 = vmax.f32 %v2031_v58, 0.0  ;;  %v2023_v63 = vadd.f32 %v4379_v8, %v2022_v60  ;;  %v4086_v8 = vld [vmem:[%s4493_s2 + $0x108] sm:$0xff]   ;;  %3925 = vmatpush3.bf16.msra.mxu0 %v4090_v13 }
 0x5c3   :  { %3900 = vmatprep.subr.bf16.mxu1 %v4086_v8  ;;  %3926 = vmatprep.subr.bf16.mxu0 %v4091_v14 }
 0x5c4   :  { %v3476_v1 = vpack.c.bf16 %v2049_v62, %v2048_v61  ;;  %v2047_v2 = vmax.f32 %v2023_v63, 0.0  ;;  %3901 = vmatpush3.bf16.msra.mxu1 %v4086_v8  ;;  %v4093_v8 = vld [vmem:[%s4493_s2 + $0x150] sm:$0xff]  }
 0x5c5   :  { %v4077_v5 = vld [vmem:[#allocation3 + $0x28] sm:$0xff]   ;;  %3902 = vmatprep.subr.bf16.mxu1 %v4087_v10 }
 0x5c6   :  { %3519 = vst [vmem:[#allocation3 + $0x38] sm:$0xff] %v3476_v1   ;;  %v3471_v3 = vpack.c.bf16 %v2047_v2, %v2046_v0  ;;  %3927 = vmatpush3.bf16.msra.mxu0 %v4091_v14 }
 0x5c7   :  { %v4076_v4 = vld [vmem:[#allocation3 + $0x20] sm:$0xff]   ;;  %3928 = vmatprep.subr.bf16.mxu0 %v4421_v15 }
 0x5c8   :  { %3518 = vst [vmem:[#allocation3 + $0x30] sm:$0xff] %v3471_v3   ;;  %3880 = vmatprep.mubr.bf16.mxu0 %v4076_v4  ;;  %3903 = vmatpush3.bf16.msra.mxu1 %v4087_v10  ;;  %v4094_v10 = vld [vmem:[%s4493_s2 + $0x148] sm:$0xff]  }
 0x5c9   :  { %3881 = vmatmul.mubr.bf16.gmra.mxu0 %v4077_v5  ;;  %3952 = vmatprep.subr.bf16.mxu1 %v4088_v11 }
 0x5ca   :  { %3929 = vmatpush3.bf16.msra.mxu0 %v4421_v15 }
 0x5cb   :  { %3930 = vmatprep.subr.bf16.mxu0 %v4093_v8 }
 0x5cd   :  { %v4079_v7 = vld [vmem:[#allocation3 + $0x38] sm:$0xff]  }
 0x5ce   :  { %3931 = vmatpush3.bf16.msra.mxu0 %v4093_v8 }
 0x5cf   :  { %v4078_v6 = vld [vmem:[#allocation3 + $0x30] sm:$0xff]   ;;  %3932 = vmatprep.subr.bf16.mxu0 %v4094_v10 }
 0x5d0   :  { %3884 = vmatprep.mubr.bf16.mxu0 %v4078_v6 }
 0x5d1   :  { %3885 = vmatmul.mubr.bf16.gmra.mxu0 %v4079_v7 }
 0x5d2   :  { %3933 = vmatpush3.bf16.msra.mxu0 %v4094_v10 }
 0x679   :  { %v3874_v16 = vpop.f32.mrf.mxu0 }
 0x67a   :  { %v2310_v18 = vadd.f32 %v3874_v16, %v3071_v19 }
 0x67b   :  { %v2301_v17 = vpop.f32.mrf.mxu0 }
 0x67c   :  { %v2302_v21 = vadd.f32 %v3071_v19, %v2301_v17  ;;  %v2366_v25 = vmax.f32 %v2310_v18, 0.0 }
 0x67d   :  { %v3875_v20 = vpop.f32.mrf.mxu0 }
 0x67e   :  { %v2313_v22 = vadd.f32 %v3875_v20, %v3071_v19  ;;  %v2364_v28 = vmax.f32 %v2302_v21, 0.0 }
 0x67f   :  { %v2304_v23 = vpop.f32.mrf.mxu0 }
 0x680   :  { %v2305_v24 = vadd.f32 %v3071_v19, %v2304_v23  ;;  %v2367_v26 = vmax.f32 %v2313_v22, 0.0 }
 0x681   :  { %v3878_v27 = vpop.f32.mrf.mxu0 }
 0x682   :  { %v2365_v29 = vmax.f32 %v2305_v24, 0.0  ;;  %v2381_v32 = vpack.c.bf16 %v2367_v26, %v2366_v25  ;;  %v2326_v36 = vadd.f32 %v3878_v27, %v3071_v19 }
 0x683   :  { %v2317_v30 = vpop.f32.mrf.mxu0 }
 0x684   :  { %v2380_v31 = vpack.c.bf16 %v2365_v29, %v2364_v28  ;;  %v2318_v34 = vadd.f32 %v3071_v19, %v2317_v30  ;;  %v2370_v43 = vmax.f32 %v2326_v36, 0.0 }
 0x685   :  { %v3879_v33 = vpop.f32.mrf.mxu0 }
 0x686   :  { %v2329_v35 = vadd.f32 %v3879_v33, %v3071_v19  ;;  %3904 = vmatprep.mubr.bf16.mxu1 %v2380_v31  ;;  %v2368_v41 = vmax.f32 %v2318_v34, 0.0 }
 0x687   :  { %v2320_v37 = vpop.f32.mrf.mxu0  ;;  %3905 = vmatmul.mubr.bf16.vlgmr.msra.gmra.mxu1 %v2381_v32 }
 0x688   :  { %v2321_v38 = vadd.f32 %v3071_v19, %v2320_v37  ;;  %3960 = vmatpush3.bf16.msra.mxu1 %v4088_v11  ;;  %v2371_v39 = vmax.f32 %v2329_v35, 0.0  ;;  %v4095_v11 = vld [vmem:[%s4493_s2 + $0x140] sm:$0xff]  }
 0x689   :  { %v3882_v40 = vpop.f32.mrf.mxu0  ;;  %3953 = vmatprep.subr.bf16.mxu1 %v4089_v12  ;;  %3934 = vmatprep.subr.bf16.mxu0 %v4095_v11 }
 0x68a   :  { %v2369_v42 = vmax.f32 %v2321_v38, 0.0  ;;  %v2383_v46 = vpack.c.bf16 %v2371_v39, %v2370_v43  ;;  %v2342_v50 = vadd.f32 %v3882_v40, %v3071_v19  ;;  %3935 = vmatpush3.bf16.msra.mxu0 %v4095_v11 }
 0x68b   :  { %v2333_v44 = vpop.f32.mrf.mxu0 }
 0x68c   :  { %v2382_v45 = vpack.c.bf16 %v2369_v42, %v2368_v41  ;;  %3961 = vmatpush3.bf16.msra.mxu1 %v4089_v12  ;;  %v2334_v48 = vadd.f32 %v3071_v19, %v2333_v44  ;;  %v2374_v57 = vmax.f32 %v2342_v50, 0.0 }
 0x68d   :  { %v3883_v47 = vpop.f32.mrf.mxu0  ;;  %3954 = vmatprep.subr.bf16.mxu1 %v4090_v13 }
 0x68e   :  { %v2345_v49 = vadd.f32 %v3883_v47, %v3071_v19  ;;  %3908 = vmatprep.mubr.bf16.mxu1 %v2382_v45  ;;  %v2372_v55 = vmax.f32 %v2334_v48, 0.0 }
 0x68f   :  { %v2336_v51 = vpop.f32.mrf.mxu0  ;;  %3909 = vmatmul.mubr.bf16.gmra.mxu1 %v2383_v46 }
 0x690   :  { %v2337_v52 = vadd.f32 %v3071_v19, %v2336_v51  ;;  %3962 = vmatpush3.bf16.msra.mxu1 %v4090_v13  ;;  %v2375_v53 = vmax.f32 %v2345_v49, 0.0 }
 0x691   :  { %v3886_v54 = vpop.f32.mrf.mxu0  ;;  %3955 = vmatprep.subr.bf16.mxu1 %v4091_v14 }
 0x692   :  { %v2373_v56 = vmax.f32 %v2337_v52, 0.0  ;;  %v2385_v60 = vpack.c.bf16 %v2375_v53, %v2374_v57  ;;  %v2358_v0 = vadd.f32 %v3886_v54, %v3071_v19 }
 0x693   :  { %v2349_v58 = vpop.f32.mrf.mxu0 }
 0x694   :  { %v2384_v59 = vpack.c.bf16 %v2373_v56, %v2372_v55  ;;  %3963 = vmatpush3.bf16.msra.mxu1 %v4091_v14  ;;  %v2350_v62 = vadd.f32 %v3071_v19, %v2349_v58  ;;  %v2378_v6 = vmax.f32 %v2358_v0, 0.0  ;;  %v3105_v14 = vld [vmem:[%s4494_s3 + $0x4] ss:$0 sm:$0xff] }
 0x695   :  { %v3887_v61 = vpop.f32.mrf.mxu0  ;;  %3956 = vmatprep.subr.bf16.mxu1 %v4421_v15 }
 0x696   :  { %v2361_v63 = vadd.f32 %v3887_v61, %v3071_v19  ;;  %3912 = vmatprep.mubr.bf16.mxu1 %v2384_v59  ;;  %v2376_v4 = vmax.f32 %v2350_v62, 0.0 }
 0x697   :  { %v2352_v1 = vpop.f32.mrf.mxu0  ;;  %3913 = vmatmul.mubr.bf16.gmra.mxu1 %v2385_v60 }
 0x698   :  { %v2353_v2 = vadd.f32 %v3071_v19, %v2352_v1  ;;  %3964 = vmatpush3.bf16.msra.mxu1 %v4421_v15  ;;  %v2379_v3 = vmax.f32 %v2361_v63, 0.0 }
 0x699   :  { %3957 = vmatprep.subr.bf16.mxu1 %v4093_v8 }
 0x69a   :  { %v2377_v5 = vmax.f32 %v2353_v2, 0.0  ;;  %v2387_v9 = vpack.c.bf16 %v2379_v3, %v2378_v6 }
 0x69c   :  { %v2386_v7 = vpack.c.bf16 %v2377_v5, %v2376_v4  ;;  %3965 = vmatpush3.bf16.msra.mxu1 %v4093_v8  ;;  %v3131_v5 = vld [vmem:[%s4494_s3 + $0x5] ss:$0 sm:$0xff] }
 0x69d   :  { %3958 = vmatprep.subr.bf16.mxu1 %v4094_v10 }
 0x69e   :  { %3916 = vmatprep.mubr.bf16.mxu1 %v2386_v7 }
 0x69f   :  { %3917 = vmatmul.mubr.bf16.gmra.mxu1 %v2387_v9 }
 0x6a0   :  { %3966 = vmatpush3.bf16.msra.mxu1 %v4094_v10 }
 0x6a1   :  { %3959 = vmatprep.subr.bf16.mxu1 %v4095_v11 }
 0x6a4   :  { %3967 = vmatpush3.bf16.msra.mxu1 %v4095_v11 }
 0x747   :  { %v3906_v12 = vpop.f32.mrf.mxu1 }
 0x748   :  { %v2504_v19 = vadd.f32 %v3906_v12, %v3105_v14 }
 0x749   :  { %v2495_v13 = vpop.f32.mrf.mxu1 }
 0x74a   :  { %v2496_v16 = vadd.f32 %v3105_v14, %v2495_v13  ;;  %v2560_v26 = vmax.f32 %v2504_v19, 0.0 }
 0x74b   :  { %v3907_v15 = vpop.f32.mrf.mxu1 }
 0x74c   :  { %v2507_v17 = vadd.f32 %v3907_v15, %v3105_v14  ;;  %v2558_v23 = vmax.f32 %v2496_v16, 0.0 }
 0x74d   :  { %v2498_v20 = vpop.f32.mrf.mxu1 }
 0x74e   :  { %v2499_v21 = vadd.f32 %v3105_v14, %v2498_v20  ;;  %v2561_v22 = vmax.f32 %v2507_v17, 0.0 }
 0x74f   :  { %v3910_v18 = vpop.f32.mrf.mxu1 }
 0x750   :  { %v2559_v24 = vmax.f32 %v2499_v21, 0.0  ;;  %v2575_v29 = vpack.c.bf16 %v2561_v22, %v2560_v26  ;;  %v2520_v32 = vadd.f32 %v3910_v18, %v3105_v14 }
 0x751   :  { %v2511_v27 = vpop.f32.mrf.mxu1 }
 0x752   :  { %v2574_v28 = vpack.c.bf16 %v2559_v24, %v2558_v23  ;;  %v2512_v30 = vadd.f32 %v3105_v14, %v2511_v27  ;;  %v2564_v39 = vmax.f32 %v2520_v32, 0.0 }
 0x753   :  { %v3911_v25 = vpop.f32.mrf.mxu1 }
 0x754   :  { %v2523_v31 = vadd.f32 %v3911_v25, %v3105_v14  ;;  %3936 = vmatprep.mubr.bf16.mxu0 %v2574_v28  ;;  %v2562_v37 = vmax.f32 %v2512_v30, 0.0 }
 0x755   :  { %v2514_v33 = vpop.f32.mrf.mxu1  ;;  %3937 = vmatmul.mubr.bf16.vlgmr.msra.gmra.mxu0 %v2575_v29 }
 0x756   :  { %v2515_v34 = vadd.f32 %v3105_v14, %v2514_v33  ;;  %v2565_v35 = vmax.f32 %v2523_v31, 0.0 }
 0x757   :  { %v3914_v36 = vpop.f32.mrf.mxu1 }
 0x758   :  { %v2563_v38 = vmax.f32 %v2515_v34, 0.0  ;;  %v2577_v42 = vpack.c.bf16 %v2565_v35, %v2564_v39  ;;  %v2536_v46 = vadd.f32 %v3914_v36, %v3105_v14 }
 0x759   :  { %v2527_v40 = vpop.f32.mrf.mxu1 }
 0x75a   :  { %v2576_v41 = vpack.c.bf16 %v2563_v38, %v2562_v37  ;;  %v2528_v44 = vadd.f32 %v3105_v14, %v2527_v40  ;;  %v2568_v53 = vmax.f32 %v2536_v46, 0.0 }
 0x75b   :  { %v3915_v43 = vpop.f32.mrf.mxu1 }
 0x75c   :  { %v2539_v45 = vadd.f32 %v3915_v43, %v3105_v14  ;;  %3940 = vmatprep.mubr.bf16.mxu0 %v2576_v41  ;;  %v2566_v51 = vmax.f32 %v2528_v44, 0.0 }
 0x75d   :  { %v2530_v47 = vpop.f32.mrf.mxu1  ;;  %3941 = vmatmul.mubr.bf16.gmra.mxu0 %v2577_v42 }
 0x75e   :  { %v2531_v48 = vadd.f32 %v3105_v14, %v2530_v47  ;;  %v2569_v49 = vmax.f32 %v2539_v45, 0.0 }
 0x75f   :  { %v3918_v50 = vpop.f32.mrf.mxu1 }
 0x760   :  { %v2567_v52 = vmax.f32 %v2531_v48, 0.0  ;;  %v2579_v56 = vpack.c.bf16 %v2569_v49, %v2568_v53  ;;  %v2552_v60 = vadd.f32 %v3918_v50, %v3105_v14 }
 0x761   :  { %v2543_v54 = vpop.f32.mrf.mxu1 }
 0x762   :  { %v2578_v55 = vpack.c.bf16 %v2567_v52, %v2566_v51  ;;  %v2544_v58 = vadd.f32 %v3105_v14, %v2543_v54  ;;  %v2572_v2 = vmax.f32 %v2552_v60, 0.0 }
 0x763   :  { %v3919_v57 = vpop.f32.mrf.mxu1 }
 0x764   :  { %v2555_v59 = vadd.f32 %v3919_v57, %v3105_v14  ;;  %3944 = vmatprep.mubr.bf16.mxu1 %v2578_v55  ;;  %v2570_v0 = vmax.f32 %v2544_v58, 0.0 }
 0x765   :  { %v2546_v61 = vpop.f32.mrf.mxu1  ;;  %3945 = vmatmul.mubr.bf16.vlgmr.msra.gmra.mxu1 %v2579_v56 }
 0x766   :  { %v2547_v62 = vadd.f32 %v3105_v14, %v2546_v61  ;;  %v2573_v63 = vmax.f32 %v2555_v59, 0.0 }
 0x768   :  { %v2571_v1 = vmax.f32 %v2547_v62, 0.0  ;;  %v2581_v4 = vpack.c.bf16 %v2573_v63, %v2572_v2 }
 0x76a   :  { %v2580_v3 = vpack.c.bf16 %v2571_v1, %v2570_v0 }
 0x76c   :  { %3948 = vmatprep.mubr.bf16.mxu1 %v2580_v3 }
 0x76d   :  { %3949 = vmatmul.mubr.bf16.gmra.mxu1 %v2581_v4 }
 0x815   :  { %v3938_v6 = vpop.f32.mrf.mxu0 }
 0x816   :  { %v2698_v7 = vadd.f32 %v3938_v6, %v3131_v5 }
 0x817   :  { %v2689_v9 = vpop.f32.mrf.mxu0 }
 0x818   :  { %v2754_v8 = vmax.f32 %v2698_v7, 0.0  ;;  %v2690_v10 = vadd.f32 %v3131_v5, %v2689_v9 }
 0x819   :  { %v3939_v11 = vpop.f32.mrf.mxu0 }
 0x81a   :  { %2770 = vst [vmem:[%s4495_s4 + $0x10] sm:$0xff] %v2754_v8  ;;  %v2752_v12 = vmax.f32 %v2690_v10, 0.0  ;;  %v2701_v13 = vadd.f32 %v3939_v11, %v3131_v5 }
 0x81b   :  { %v2692_v14 = vpop.f32.mrf.mxu0 }
 0x81c   :  { %2768 = vst [vmem:[%s4495_s4] sm:$0xff] %v2752_v12  ;;  %v2755_v15 = vmax.f32 %v2701_v13, 0.0  ;;  %v2693_v16 = vadd.f32 %v3131_v5, %v2692_v14 }
 0x81d   :  { %v3942_v17 = vpop.f32.mrf.mxu0 }
 0x81e   :  { %2771 = vst [vmem:[%s4495_s4 + $0x18] sm:$0xff] %v2755_v15  ;;  %v2753_v19 = vmax.f32 %v2693_v16, 0.0  ;;  %v2714_v20 = vadd.f32 %v3942_v17, %v3131_v5 }
 0x81f   :  { %v2705_v21 = vpop.f32.mrf.mxu0 }
 0x820   :  { %2769 = vst [vmem:[%s4495_s4 + $0x8] sm:$0xff] %v2753_v19  ;;  %v2758_v22 = vmax.f32 %v2714_v20, 0.0  ;;  %v2706_v18 = vadd.f32 %v3131_v5, %v2705_v21 }
 0x821   :  { %v3943_v23 = vpop.f32.mrf.mxu0 }
 0x822   :  { %2774 = vst [vmem:[%s4495_s4 + $0x30] sm:$0xff] %v2758_v22  ;;  %v2756_v24 = vmax.f32 %v2706_v18, 0.0  ;;  %v2717_v26 = vadd.f32 %v3943_v23, %v3131_v5 }
 0x823   :  { %v2708_v27 = vpop.f32.mrf.mxu0 }
 0x824   :  { %2772 = vst [vmem:[%s4495_s4 + $0x20] sm:$0xff] %v2756_v24  ;;  %v2759_v28 = vmax.f32 %v2717_v26, 0.0  ;;  %v2709_v29 = vadd.f32 %v3131_v5, %v2708_v27 }
 0x825   :  { %v3946_v25 = vpop.f32.mrf.mxu1 }
 0x826   :  { %2775 = vst [vmem:[%s4495_s4 + $0x38] sm:$0xff] %v2759_v28  ;;  %v2757_v30 = vmax.f32 %v2709_v29, 0.0  ;;  %v2730_v31 = vadd.f32 %v3946_v25, %v3131_v5 }
 0x827   :  { %v2721_v32 = vpop.f32.mrf.mxu1 }
 0x828   :  { %2773 = vst [vmem:[%s4495_s4 + $0x28] sm:$0xff] %v2757_v30  ;;  %v2762_v33 = vmax.f32 %v2730_v31, 0.0  ;;  %v2722_v34 = vadd.f32 %v3131_v5, %v2721_v32 }
 0x829   :  { %v3947_v35 = vpop.f32.mrf.mxu1 }
 0x82a   :  { %2778 = vst [vmem:[%s4495_s4 + $0x50] sm:$0xff] %v2762_v33  ;;  %v2760_v36 = vmax.f32 %v2722_v34, 0.0  ;;  %v2733_v37 = vadd.f32 %v3947_v35, %v3131_v5 }
 0x82b   :  { %v2724_v38 = vpop.f32.mrf.mxu1 }
 0x82c   :  { %2776 = vst [vmem:[%s4495_s4 + $0x40] sm:$0xff] %v2760_v36  ;;  %v2763_v39 = vmax.f32 %v2733_v37, 0.0  ;;  %v2725_v40 = vadd.f32 %v3131_v5, %v2724_v38 }
 0x82d   :  { %v3950_v41 = vpop.f32.mrf.mxu1 }
 0x82e   :  { %2779 = vst [vmem:[%s4495_s4 + $0x58] sm:$0xff] %v2763_v39  ;;  %v2761_v42 = vmax.f32 %v2725_v40, 0.0  ;;  %v2746_v43 = vadd.f32 %v3950_v41, %v3131_v5 }
 0x82f   :  { %v2737_v44 = vpop.f32.mrf.mxu1 }
 0x830   :  { %2777 = vst [vmem:[%s4495_s4 + $0x48] sm:$0xff] %v2761_v42  ;;  %v2766_v45 = vmax.f32 %v2746_v43, 0.0  ;;  %v2738_v46 = vadd.f32 %v3131_v5, %v2737_v44 }
 0x831   :  { %v3951_v47 = vpop.f32.mrf.mxu1 }
 0x832   :  { %2782 = vst [vmem:[%s4495_s4 + $0x70] sm:$0xff] %v2766_v45  ;;  %v2764_v48 = vmax.f32 %v2738_v46, 0.0  ;;  %v2749_v49 = vadd.f32 %v3951_v47, %v3131_v5 }
 0x833   :  { %v2740_v50 = vpop.f32.mrf.mxu1 }
 0x834   :  { %2780 = vst [vmem:[%s4495_s4 + $0x60] sm:$0xff] %v2764_v48  ;;  %v2767_v51 = vmax.f32 %v2749_v49, 0.0  ;;  %v2741_v52 = vadd.f32 %v3131_v5, %v2740_v50 }
 0x836   :  { %2783 = vst [vmem:[%s4495_s4 + $0x78] sm:$0xff] %v2767_v51  ;;  %v2765_v53 = vmax.f32 %v2741_v52, 0.0 }
 0x838   :  { %2781 = vst [vmem:[%s4495_s4 + $0x68] sm:$0xff] %v2765_v53 }
 0x839   :  { %2788 = vsyncmov [#allocation5] }
 0x83c   :  { %s2789_s23 = vpop.sfrf %2788 }
 0x83d   :  { %p3140_p0 = scmp.ne.s32.totalorder %s2789_s23, 0 }
 0x83f   :  { %2793 = shalt.err (%p3140_p0)  }
 0x840   :  { %2795 = vsyncmov [#allocation5 + $0x1] }
 0x843   :  { %s2796_s24 = vpop.sfrf %2795 }
 0x844   :  { %p3141_p1 = scmp.ne.s32.totalorder %s2796_s24, 0 }
 0x846   :  { %2800 = shalt.err (%p3141_p1)  }

</bundles_post_ra>
